<compile_context>
chip_gen: v5e
topology: v5e:2x2
jax: 0.10.0
libtpu: 0.0.40
codegen_flags: <defaults>
</compile_context>

<pallas_src>
import jax
import jax.numpy as jnp
from jax import lax
from jax.experimental import pallas as pl
from jax.experimental.pallas import tpu as pltpu


# ----------------------------- Pallas kernel --------------------------------

def _crf_logz_kernel(em_ref, mask_ref, exp_trans_ref, init_ref, exp_eos_ref,
                     logz_ref, c_ref, m_ref):
    """One (batch_tile, seq_chunk) grid step of the CRF forward algorithm.

    Scaled-exp carry across sequence chunks (VMEM scratch):
      c_ref (Bt, L): exp(alphas - m), row-max normalised (rowmax == 1)
      m_ref (Bt, 1): per-row log-scale, so alphas = m + log(c)
    """
    sc = pl.program_id(1)
    bt, ts, nl = em_ref.shape

    @pl.when(sc == 0)
    def _init():
        # c = one-hot(BOS), m = 0: the first loop iteration then reproduces
        # alphas_0 = transitions[BOS, :] + emissions[:, 0] exactly.
        c_ref[...] = jnp.broadcast_to(init_ref[...], (bt, nl))
        m_ref[...] = jnp.zeros_like(m_ref)

    exp_trans = exp_trans_ref[...]              # (L, L), loop-invariant (hoisted)
    c = c_ref[...]
    m = m_ref[...]

    for t in range(ts):                         # static unroll (ts <= 64)
        em = em_ref[:, t, :]                    # (Bt, L) emissions at this step
        valid = mask_ref[t] != 0.0              # (Bt, 1)
        me = jnp.max(em, axis=1, keepdims=True)                         # (Bt, 1)
        s = jnp.dot(c, exp_trans, preferred_element_type=jnp.float32)   # MXU
        q = jnp.exp(em - me) * s                                        # EUP+VPU
        r = jnp.max(q, axis=1, keepdims=True)                           # XLU
        c_new = q / r               # exact div (approx recip would bias logZ)
        m_new = m + me + jnp.log(r)
        c = jnp.where(valid, c_new, c)          # masked steps keep the carry
        m = jnp.where(valid, m_new, m)

    c_ref[...] = c
    m_ref[...] = m

    @pl.when(sc == pl.num_programs(1) - 1)
    def _finalize():
        # logZ = logsumexp_j(alphas_j + T[j,EOS]) = m + log(sum_j c_j*exp(T[j,EOS]))
        z = jnp.sum(c * exp_eos_ref[...], axis=1, keepdims=True)        # (Bt, 1)
        logz_ref[...] = m + jnp.log(z)


# ----------------------------- tile heuristics -------------------------------

def _round_up(x, m):
    return (x + m - 1) // m * m


def _pick_seq_tile(sp):
    """Largest multiple of 8 <= 64 dividing the (padded) sequence length."""
    if sp <= 64:
        return sp
    best = 8
    for ts in range(8, 65, 8):
        if sp % ts == 0:
            best = ts
    return best


def _pick_batch_tile(B, ts, L):
    lp = _round_up(L, 128)
    cap = max(8, (8 * 1024 * 1024) // (ts * lp * 4))   # emissions chunk <= ~8 MiB/buffer
    divisors = [d for d in range(B, 0, -1) if B % d == 0]
    bt = B
    for d in divisors:
        if d <= cap and (d == B or d % 8 == 0):
            bt = d
            break
    if bt == B and B >= 512:
        # v7x megacore: give the "parallel" batch axis >= 2 blocks.
        for d in divisors:
            if d < B and d % 8 == 0:
                bt = d
                break
    return bt


def _vmem_budget_bytes(bt, ts, L):
    lp = _round_up(L, 128)
    btp = _round_up(bt, 8)
    tsp = _round_up(ts, 8)
    em = bt * tsp * lp * 4 * 2            # emissions chunk, double-buffered
    msk = ts * btp * 128 * 4 * 2          # mask chunk (lane-padded), double-buffered
    consts = (_round_up(L, 8) * lp + 2 * 8 * lp) * 4 * 2
    out = btp * 128 * 4 * 2
    scratch = bt * lp * 4 + btp * 128 * 4
    raw = em + msk + consts + out + scratch
    return int(min(128 * 1024 * 1024, 2 * raw + 16 * 1024 * 1024))


# ----------------------------- gold-path score (XLA) -------------------------

def _gold_score(emissions, tags, mask, transitions, bos, eos):
    """Dependency-free gold-path score: plain gathers + masked sum over S."""
    e_all = jnp.take_along_axis(emissions, tags[:, :, None], axis=2)[:, :, 0]   # (B, S)
    first_tags = tags[:, 0]
    last_idx = jnp.sum(mask, axis=1).astype(jnp.int32) - 1
    last_tags = jnp.take_along_axis(tags, last_idx[:, None], axis=1)[:, 0]
    t_all = transitions[tags[:, :-1], tags[:, 1:]]                              # (B, S-1)
    scores = transitions[bos, first_tags] + e_all[:, 0]
    scores = scores + jnp.sum((e_all[:, 1:] + t_all) * mask[:, 1:], axis=1)
    scores = scores + transitions[last_tags, eos]
    return scores


# ----------------------------- wrapper ---------------------------------------

def crf_nll_pallas(emissions, tags, mask, transitions, bos_tag_id, eos_tag_id,
                   *, batch_tile=None, seq_tile=None):
    """emissions (B,S,L), tags (B,S) int, mask (B,S) -> nll (B,) f32."""
    B, S, L = emissions.shape
    emissions = emissions.astype(jnp.float32)
    mask = mask.astype(jnp.float32)
    trans = transitions.astype(jnp.float32)
    tags = tags.astype(jnp.int32)

    # ---- tile selection ----
    if seq_tile is None:
        Ts = _pick_seq_tile(_round_up(S, 8))
    else:
        Ts = int(seq_tile)
    Sp = _round_up(S, Ts)
    assert Ts % 8 == 0 or Ts == Sp, \
        "seq tile must be a multiple of 8 (or the whole padded sequence)"

    Bt = _pick_batch_tile(B, Ts, L) if batch_tile is None else int(batch_tile)
    assert B % Bt == 0 and (Bt == B or Bt % 8 == 0), \
        "batch tile must divide B and be a multiple of 8 (or B itself)"

    # ---- small kernel-side constants ----
    exp_trans = jnp.exp(trans)                                              # (L, L)
    init_row = (jnp.arange(L) == bos_tag_id).astype(jnp.float32)[None, :]   # (1, L)
    exp_eos_row = jnp.exp(trans[:, eos_tag_id])[None, :]                    # (1, L)

    # Step 0 is handled unconditionally (as in the reference); padded steps
    # (if S was rounded up to a multiple of Ts) are masked out -> no-ops.
    mask_k = mask.at[:, 0].set(1.0)
    em_k = emissions
    if Sp > S:
        em_k = jnp.pad(em_k, ((0, 0), (0, Sp - S), (0, 0)))
        mask_k = jnp.pad(mask_k, ((0, 0), (0, Sp - S)))
    mask_sb = jnp.transpose(mask_k, (1, 0))[:, :, None]                     # (Sp, B, 1) -- tiny

    grid = (B // Bt, Sp // Ts)
    logz = pl.pallas_call(
        _crf_logz_kernel,
        out_shape=jax.ShapeDtypeStruct((B, 1), jnp.float32),
        grid_spec=pltpu.PrefetchScalarGridSpec(
            num_scalar_prefetch=0,
            grid=grid,
            in_specs=[
                pl.BlockSpec((Bt, Ts, L), lambda b, s: (b, s, 0)),   # emissions (native layout)
                pl.BlockSpec((Ts, Bt, 1), lambda b, s: (s, b, 0)),   # mask chunk
                pl.BlockSpec((L, L), lambda b, s: (0, 0)),           # exp(transitions)
                pl.BlockSpec((1, L), lambda b, s: (0, 0)),           # one-hot(BOS)
                pl.BlockSpec((1, L), lambda b, s: (0, 0)),           # exp(trans[:, EOS])
            ],
            out_specs=pl.BlockSpec((Bt, 1), lambda b, s: (b, 0)),
            scratch_shapes=[
                pltpu.VMEM((Bt, L), jnp.float32),   # c  (scaled alphas)
                pltpu.VMEM((Bt, 1), jnp.float32),   # m  (log-scale)
            ],
        ),
        compiler_params=pltpu.CompilerParams(
            dimension_semantics=("parallel", "arbitrary"),
            vmem_limit_bytes=_vmem_budget_bytes(Bt, Ts, L)),
    )(em_k, mask_sb, exp_trans, init_row, exp_eos_row)

    gold = _gold_score(emissions, tags, mask, trans, bos_tag_id, eos_tag_id)
    return logz[:, 0] - gold


# ----------------------------- pure-JAX reference ----------------------------

def crf_nll_reference(emissions, tags, mask, transitions, bos, eos):
    """Pure-JAX mirror of the PyTorch module (batch-first)."""
    B, S, L = emissions.shape
    first_tags = tags[:, 0]
    last_idx = jnp.sum(mask, axis=1).astype(jnp.int32) - 1
    last_tags = jnp.take_along_axis(tags, last_idx[:, None], axis=1)[:, 0]

    scores = transitions[bos, first_tags] + jnp.take_along_axis(
        emissions[:, 0], first_tags[:, None], axis=1)[:, 0]
    alphas = transitions[bos, :][None, :] + emissions[:, 0]
    for i in range(1, S):
        is_valid = mask[:, i]
        prev, curr = tags[:, i - 1], tags[:, i]
        e = jnp.take_along_axis(emissions[:, i], curr[:, None], axis=1)[:, 0]
        t = transitions[prev, curr]
        scores = scores + (e + t) * is_valid
        blk = emissions[:, i][:, None, :] + transitions[None, :, :] + alphas[:, :, None]
        new_alphas = jax.scipy.special.logsumexp(blk, axis=1)
        v = is_valid[:, None]
        alphas = v * new_alphas + (1.0 - v) * alphas
    scores = scores + transitions[last_tags, eos]
    end = alphas + transitions[:, eos][None, :]
    partition = jax.scipy.special.logsumexp(end, axis=1)
    return -(scores - partition)


# ----------------------------- demo / self-test -------------------------------

if __name__ == "__main__":
    key = jax.random.PRNGKey(0)

    def make_case(k, B, S, L, lengths):
        BOS, EOS = L - 2, L - 1
        k_trans, k_em, k_tags = jax.random.split(k, 3)
        # init_weights(): U(-0.1, 0.1), then forbid ->BOS and EOS-> transitions.
        transitions = jax.random.uniform(k_trans, (L, L), jnp.float32, -0.1, 0.1)
        transitions = transitions.at[:, BOS].set(-10000.0)
        transitions = transitions.at[EOS, :].set(-10000.0)
        emissions = jax.random.normal(k_em, (B, S, L), jnp.float32)
        tags = jax.random.randint(k_tags, (B, S), 0, L - 2).astype(jnp.int32)
        mask = (jnp.arange(S)[None, :] < lengths[:, None]).astype(jnp.float32)
        return emissions, tags, mask, transitions, BOS, EOS

    k1, k2 = jax.random.split(key)

    # Case 1: small, single grid step (default tiles).
    B, S, L = 4, 8, 6
    lengths = jnp.array([8, 6, 5, 7], dtype=jnp.int32)
    em, tg, mk, tr, BOS, EOS = make_case(k1, B, S, L, lengths)
    nll = crf_nll_pallas(em, tg, mk, tr, BOS, EOS)
    jax.block_until_ready(nll)
    nll_ref = crf_nll_reference(em, tg, mk, tr, BOS, EOS)
    assert nll.shape == (B,)
    assert jnp.allclose(nll, nll_ref, rtol=1e-4, atol=1e-4), (nll, nll_ref)

    # Case 2: multi-chunk sequence + multi-block batch (exercises scratch carries,
    # masked steps crossing chunk boundaries, and the "parallel" batch axis).
    B, S, L = 16, 24, 10
    lengths = jax.random.randint(k2, (B,), 1, S + 1).astype(jnp.int32)
    em, tg, mk, tr, BOS, EOS = make_case(k2, B, S, L, lengths)
    nll = crf_nll_pallas(em, tg, mk, tr, BOS, EOS, batch_tile=8, seq_tile=8)
    jax.block_until_ready(nll)
    nll_ref = crf_nll_reference(em, tg, mk, tr, BOS, EOS)
    assert jnp.allclose(nll, nll_ref, rtol=1e-4, atol=1e-4), (nll, nll_ref)

    print("KERNEL_OK")
</pallas_src>

<mosaic_0001>
module attributes {stable_mosaic.version = 11 : i64} {
  func.func @_crf_logz_kernel(%arg0: i32, %arg1: i32, %arg2: memref<4x8x6xf32, #tpu.memory_space<vmem>>, %arg3: memref<8x4x1xf32, #tpu.memory_space<vmem>>, %arg4: memref<6x6xf32, #tpu.memory_space<vmem>>, %arg5: memref<1x6xf32, #tpu.memory_space<vmem>>, %arg6: memref<1x6xf32, #tpu.memory_space<vmem>>, %arg7: memref<4x1xf32, #tpu.memory_space<vmem>>, %arg8: memref<4x6xf32, #tpu.memory_space<vmem>>, %arg9: memref<4x1xf32, #tpu.memory_space<vmem>>) attributes {dimension_semantics = [#tpu.dimension_semantics<parallel>, #tpu.dimension_semantics<arbitrary>], iteration_bounds = array<i64: 1, 1>, scalar_prefetch = 0 : i64, scratch_operands = 2 : i64, tpu.core_type = #tpu.core_type<tc>, window_params = [{transform_indices = @transform_0, window_bounds = array<i64: 4, 8, 6>}, {transform_indices = @transform_1, window_bounds = array<i64: 8, 4, 1>}, {pipeline_mode = #tpu.pipeline_mode<synchronous>, transform_indices = @transform_2, window_bounds = array<i64: 6, 6>}, {pipeline_mode = #tpu.pipeline_mode<synchronous>, transform_indices = @transform_3, window_bounds = array<i64: 1, 6>}, {pipeline_mode = #tpu.pipeline_mode<synchronous>, transform_indices = @transform_4, window_bounds = array<i64: 1, 6>}, {transform_indices = @transform_5, window_bounds = array<i64: 4, 1>}]} {
    %c0_i32 = arith.constant 0 : i32
    %0 = arith.cmpi eq, %arg1, %c0_i32 : i32
    %1 = arith.extui %0 : i1 to i32
    %c0_i32_0 = arith.constant 0 : i32
    %2 = arith.cmpi ne, %1, %c0_i32_0 : i32
    scf.if %2 {
      %c0_84 = arith.constant 0 : index
      %c0_85 = arith.constant 0 : index
      %203 = vector.load %arg5[%c0_84, %c0_85] : memref<1x6xf32, #tpu.memory_space<vmem>>, vector<1x6xf32>
      %204 = vector.shape_cast %203 : vector<1x6xf32> to vector<1x6xf32>
      %205 = vector.broadcast %204 : vector<1x6xf32> to vector<4x6xf32>
      %c0_86 = arith.constant 0 : index
      %c0_87 = arith.constant 0 : index
      %206 = vector.load %arg8[%c0_86, %c0_87] : memref<4x6xf32, #tpu.memory_space<vmem>>, vector<4x6xf32>
      tpu.vector_store %arg8[%c0_86, %c0_87], %205 {strides = array<i32>} : memref<4x6xf32, #tpu.memory_space<vmem>>, vector<4x6xf32>,
      %cst_88 = arith.constant 0.000000e+00 : f32
      %207 = vector.broadcast %cst_88 : f32 to vector<4x1xf32>
      %c0_89 = arith.constant 0 : index
      %c0_90 = arith.constant 0 : index
      %208 = vector.load %arg9[%c0_89, %c0_90] : memref<4x1xf32, #tpu.memory_space<vmem>>, vector<4x1xf32>
      tpu.vector_store %arg9[%c0_89, %c0_90], %207 {strides = array<i32>} : memref<4x1xf32, #tpu.memory_space<vmem>>, vector<4x1xf32>,
    } else {
    }
    %c0 = arith.constant 0 : index
    %c0_1 = arith.constant 0 : index
    %3 = vector.load %arg4[%c0, %c0_1] : memref<6x6xf32, #tpu.memory_space<vmem>>, vector<6x6xf32>
    %c0_2 = arith.constant 0 : index
    %c0_3 = arith.constant 0 : index
    %4 = vector.load %arg8[%c0_2, %c0_3] : memref<4x6xf32, #tpu.memory_space<vmem>>, vector<4x6xf32>
    %c0_4 = arith.constant 0 : index
    %c0_5 = arith.constant 0 : index
    %5 = vector.load %arg9[%c0_4, %c0_5] : memref<4x1xf32, #tpu.memory_space<vmem>>, vector<4x1xf32>
    %c0_6 = arith.constant 0 : index
    %c0_7 = arith.constant 0 : index
    %c0_8 = arith.constant 0 : index
    %6 = vector.load %arg2[%c0_6, %c0_7, %c0_8] : memref<4x8x6xf32, #tpu.memory_space<vmem>>, vector<4x1x6xf32>
    %7 = vector.shape_cast %6 : vector<4x1x6xf32> to vector<4x6xf32>
    %c0_9 = arith.constant 0 : index
    %c0_10 = arith.constant 0 : index
    %c0_11 = arith.constant 0 : index
    %8 = vector.load %arg3[%c0_9, %c0_10, %c0_11] : memref<8x4x1xf32, #tpu.memory_space<vmem>>, vector<1x4x1xf32>
    %9 = vector.shape_cast %8 : vector<1x4x1xf32> to vector<4x1xf32>
    %cst = arith.constant 0.000000e+00 : f32
    %10 = vector.broadcast %cst : f32 to vector<4x1xf32>
    %11 = arith.cmpf one, %9, %10 : vector<4x1xf32>
    %cst_12 = arith.constant dense<0xFF800000> : vector<4xf32>
    %12 = vector.multi_reduction <maximumf>, %7, %cst_12 [1] : vector<4x6xf32> to vector<4xf32>
    %13 = vector.shape_cast %12 : vector<4xf32> to vector<4x1xf32>
    %cst_13 = arith.constant dense<0.000000e+00> : vector<4x6xf32>
    %14 = tpu.matmul %4, %3, %cst_13 {dimension_numbers = #tpu.dot_dimension_numbers<[1], [0], [0], [1], [0, 0, 1, 1], [], []>} : vector<4x6xf32>, vector<6x6xf32>, vector<4x6xf32> -> vector<4x6xf32>
    %15 = vector.broadcast %13 : vector<4x1xf32> to vector<4x6xf32>
    %16 = arith.subf %7, %15 : vector<4x6xf32>
    %17 = math.exp %16 : vector<4x6xf32>
    %18 = arith.mulf %17, %14 : vector<4x6xf32>
    %cst_14 = arith.constant dense<0xFF800000> : vector<4xf32>
    %19 = vector.multi_reduction <maximumf>, %18, %cst_14 [1] : vector<4x6xf32> to vector<4xf32>
    %20 = vector.shape_cast %19 : vector<4xf32> to vector<4x1xf32>
    %21 = vector.broadcast %20 : vector<4x1xf32> to vector<4x6xf32>
    %22 = arith.divf %18, %21 : vector<4x6xf32>
    %23 = arith.addf %5, %13 : vector<4x1xf32>
    %24 = math.log %20 : vector<4x1xf32>
    %25 = arith.addf %23, %24 : vector<4x1xf32>
    %26 = vector.shape_cast %11 : vector<4x1xi1> to vector<4x1xi1>
    %27 = vector.broadcast %26 : vector<4x1xi1> to vector<4x6xi1>
    %28 = arith.select %27, %22, %4 : vector<4x6xi1>, vector<4x6xf32>
    %29 = arith.select %11, %25, %5 : vector<4x1xi1>, vector<4x1xf32>
    %c0_15 = arith.constant 0 : index
    %c1 = arith.constant 1 : index
    %c0_16 = arith.constant 0 : index
    %30 = vector.load %arg2[%c0_15, %c1, %c0_16] : memref<4x8x6xf32, #tpu.memory_space<vmem>>, vector<4x1x6xf32>
    %31 = vector.shape_cast %30 : vector<4x1x6xf32> to vector<4x6xf32>
    %c1_17 = arith.constant 1 : index
    %c0_18 = arith.constant 0 : index
    %c0_19 = arith.constant 0 : index
    %32 = vector.load %arg3[%c1_17, %c0_18, %c0_19] : memref<8x4x1xf32, #tpu.memory_space<vmem>>, vector<1x4x1xf32>
    %33 = vector.shape_cast %32 : vector<1x4x1xf32> to vector<4x1xf32>
    %cst_20 = arith.constant 0.000000e+00 : f32
    %34 = vector.broadcast %cst_20 : f32 to vector<4x1xf32>
    %35 = arith.cmpf one, %33, %34 : vector<4x1xf32>
    %cst_21 = arith.constant dense<0xFF800000> : vector<4xf32>
    %36 = vector.multi_reduction <maximumf>, %31, %cst_21 [1] : vector<4x6xf32> to vector<4xf32>
    %37 = vector.shape_cast %36 : vector<4xf32> to vector<4x1xf32>
    %cst_22 = arith.constant dense<0.000000e+00> : vector<4x6xf32>
    %38 = tpu.matmul %28, %3, %cst_22 {dimension_numbers = #tpu.dot_dimension_numbers<[1], [0], [0], [1], [0, 0, 1, 1], [], []>} : vector<4x6xf32>, vector<6x6xf32>, vector<4x6xf32> -> vector<4x6xf32>
    %39 = vector.broadcast %37 : vector<4x1xf32> to vector<4x6xf32>
    %40 = arith.subf %31, %39 : vector<4x6xf32>
    %41 = math.exp %40 : vector<4x6xf32>
    %42 = arith.mulf %41, %38 : vector<4x6xf32>
    %cst_23 = arith.constant dense<0xFF800000> : vector<4xf32>
    %43 = vector.multi_reduction <maximumf>, %42, %cst_23 [1] : vector<4x6xf32> to vector<4xf32>
    %44 = vector.shape_cast %43 : vector<4xf32> to vector<4x1xf32>
    %45 = vector.broadcast %44 : vector<4x1xf32> to vector<4x6xf32>
    %46 = arith.divf %42, %45 : vector<4x6xf32>
    %47 = arith.addf %29, %37 : vector<4x1xf32>
    %48 = math.log %44 : vector<4x1xf32>
    %49 = arith.addf %47, %48 : vector<4x1xf32>
    %50 = vector.shape_cast %35 : vector<4x1xi1> to vector<4x1xi1>
    %51 = vector.broadcast %50 : vector<4x1xi1> to vector<4x6xi1>
    %52 = arith.select %51, %46, %28 : vector<4x6xi1>, vector<4x6xf32>
    %53 = arith.select %35, %49, %29 : vector<4x1xi1>, vector<4x1xf32>
    %c0_24 = arith.constant 0 : index
    %c2 = arith.constant 2 : index
    %c0_25 = arith.constant 0 : index
    %54 = vector.load %arg2[%c0_24, %c2, %c0_25] : memref<4x8x6xf32, #tpu.memory_space<vmem>>, vector<4x1x6xf32>
    %55 = vector.shape_cast %54 : vector<4x1x6xf32> to vector<4x6xf32>
    %c2_26 = arith.constant 2 : index
    %c0_27 = arith.constant 0 : index
    %c0_28 = arith.constant 0 : index
    %56 = vector.load %arg3[%c2_26, %c0_27, %c0_28] : memref<8x4x1xf32, #tpu.memory_space<vmem>>, vector<1x4x1xf32>
    %57 = vector.shape_cast %56 : vector<1x4x1xf32> to vector<4x1xf32>
    %cst_29 = arith.constant 0.000000e+00 : f32
    %58 = vector.broadcast %cst_29 : f32 to vector<4x1xf32>
    %59 = arith.cmpf one, %57, %58 : vector<4x1xf32>
    %cst_30 = arith.constant dense<0xFF800000> : vector<4xf32>
    %60 = vector.multi_reduction <maximumf>, %55, %cst_30 [1] : vector<4x6xf32> to vector<4xf32>
    %61 = vector.shape_cast %60 : vector<4xf32> to vector<4x1xf32>
    %cst_31 = arith.constant dense<0.000000e+00> : vector<4x6xf32>
    %62 = tpu.matmul %52, %3, %cst_31 {dimension_numbers = #tpu.dot_dimension_numbers<[1], [0], [0], [1], [0, 0, 1, 1], [], []>} : vector<4x6xf32>, vector<6x6xf32>, vector<4x6xf32> -> vector<4x6xf32>
    %63 = vector.broadcast %61 : vector<4x1xf32> to vector<4x6xf32>
    %64 = arith.subf %55, %63 : vector<4x6xf32>
    %65 = math.exp %64 : vector<4x6xf32>
    %66 = arith.mulf %65, %62 : vector<4x6xf32>
    %cst_32 = arith.constant dense<0xFF800000> : vector<4xf32>
    %67 = vector.multi_reduction <maximumf>, %66, %cst_32 [1] : vector<4x6xf32> to vector<4xf32>
    %68 = vector.shape_cast %67 : vector<4xf32> to vector<4x1xf32>
    %69 = vector.broadcast %68 : vector<4x1xf32> to vector<4x6xf32>
    %70 = arith.divf %66, %69 : vector<4x6xf32>
    %71 = arith.addf %53, %61 : vector<4x1xf32>
    %72 = math.log %68 : vector<4x1xf32>
    %73 = arith.addf %71, %72 : vector<4x1xf32>
    %74 = vector.shape_cast %59 : vector<4x1xi1> to vector<4x1xi1>
    %75 = vector.broadcast %74 : vector<4x1xi1> to vector<4x6xi1>
    %76 = arith.select %75, %70, %52 : vector<4x6xi1>, vector<4x6xf32>
    %77 = arith.select %59, %73, %53 : vector<4x1xi1>, vector<4x1xf32>
    %c0_33 = arith.constant 0 : index
    %c3 = arith.constant 3 : index
    %c0_34 = arith.constant 0 : index
    %78 = vector.load %arg2[%c0_33, %c3, %c0_34] : memref<4x8x6xf32, #tpu.memory_space<vmem>>, vector<4x1x6xf32>
    %79 = vector.shape_cast %78 : vector<4x1x6xf32> to vector<4x6xf32>
    %c3_35 = arith.constant 3 : index
    %c0_36 = arith.constant 0 : index
    %c0_37 = arith.constant 0 : index
    %80 = vector.load %arg3[%c3_35, %c0_36, %c0_37] : memref<8x4x1xf32, #tpu.memory_space<vmem>>, vector<1x4x1xf32>
    %81 = vector.shape_cast %80 : vector<1x4x1xf32> to vector<4x1xf32>
    %cst_38 = arith.constant 0.000000e+00 : f32
    %82 = vector.broadcast %cst_38 : f32 to vector<4x1xf32>
    %83 = arith.cmpf one, %81, %82 : vector<4x1xf32>
    %cst_39 = arith.constant dense<0xFF800000> : vector<4xf32>
    %84 = vector.multi_reduction <maximumf>, %79, %cst_39 [1] : vector<4x6xf32> to vector<4xf32>
    %85 = vector.shape_cast %84 : vector<4xf32> to vector<4x1xf32>
    %cst_40 = arith.constant dense<0.000000e+00> : vector<4x6xf32>
    %86 = tpu.matmul %76, %3, %cst_40 {dimension_numbers = #tpu.dot_dimension_numbers<[1], [0], [0], [1], [0, 0, 1, 1], [], []>} : vector<4x6xf32>, vector<6x6xf32>, vector<4x6xf32> -> vector<4x6xf32>
    %87 = vector.broadcast %85 : vector<4x1xf32> to vector<4x6xf32>
    %88 = arith.subf %79, %87 : vector<4x6xf32>
    %89 = math.exp %88 : vector<4x6xf32>
    %90 = arith.mulf %89, %86 : vector<4x6xf32>
    %cst_41 = arith.constant dense<0xFF800000> : vector<4xf32>
    %91 = vector.multi_reduction <maximumf>, %90, %cst_41 [1] : vector<4x6xf32> to vector<4xf32>
    %92 = vector.shape_cast %91 : vector<4xf32> to vector<4x1xf32>
    %93 = vector.broadcast %92 : vector<4x1xf32> to vector<4x6xf32>
    %94 = arith.divf %90, %93 : vector<4x6xf32>
    %95 = arith.addf %77, %85 : vector<4x1xf32>
    %96 = math.log %92 : vector<4x1xf32>
    %97 = arith.addf %95, %96 : vector<4x1xf32>
    %98 = vector.shape_cast %83 : vector<4x1xi1> to vector<4x1xi1>
    %99 = vector.broadcast %98 : vector<4x1xi1> to vector<4x6xi1>
    %100 = arith.select %99, %94, %76 : vector<4x6xi1>, vector<4x6xf32>
    %101 = arith.select %83, %97, %77 : vector<4x1xi1>, vector<4x1xf32>
    %c0_42 = arith.constant 0 : index
    %c4 = arith.constant 4 : index
    %c0_43 = arith.constant 0 : index
    %102 = vector.load %arg2[%c0_42, %c4, %c0_43] : memref<4x8x6xf32, #tpu.memory_space<vmem>>, vector<4x1x6xf32>
    %103 = vector.shape_cast %102 : vector<4x1x6xf32> to vector<4x6xf32>
    %c4_44 = arith.constant 4 : index
    %c0_45 = arith.constant 0 : index
    %c0_46 = arith.constant 0 : index
    %104 = vector.load %arg3[%c4_44, %c0_45, %c0_46] : memref<8x4x1xf32, #tpu.memory_space<vmem>>, vector<1x4x1xf32>
    %105 = vector.shape_cast %104 : vector<1x4x1xf32> to vector<4x1xf32>
    %cst_47 = arith.constant 0.000000e+00 : f32
    %106 = vector.broadcast %cst_47 : f32 to vector<4x1xf32>
    %107 = arith.cmpf one, %105, %106 : vector<4x1xf32>
    %cst_48 = arith.constant dense<0xFF800000> : vector<4xf32>
    %108 = vector.multi_reduction <maximumf>, %103, %cst_48 [1] : vector<4x6xf32> to vector<4xf32>
    %109 = vector.shape_cast %108 : vector<4xf32> to vector<4x1xf32>
    %cst_49 = arith.constant dense<0.000000e+00> : vector<4x6xf32>
    %110 = tpu.matmul %100, %3, %cst_49 {dimension_numbers = #tpu.dot_dimension_numbers<[1], [0], [0], [1], [0, 0, 1, 1], [], []>} : vector<4x6xf32>, vector<6x6xf32>, vector<4x6xf32> -> vector<4x6xf32>
    %111 = vector.broadcast %109 : vector<4x1xf32> to vector<4x6xf32>
    %112 = arith.subf %103, %111 : vector<4x6xf32>
    %113 = math.exp %112 : vector<4x6xf32>
    %114 = arith.mulf %113, %110 : vector<4x6xf32>
    %cst_50 = arith.constant dense<0xFF800000> : vector<4xf32>
    %115 = vector.multi_reduction <maximumf>, %114, %cst_50 [1] : vector<4x6xf32> to vector<4xf32>
    %116 = vector.shape_cast %115 : vector<4xf32> to vector<4x1xf32>
    %117 = vector.broadcast %116 : vector<4x1xf32> to vector<4x6xf32>
    %118 = arith.divf %114, %117 : vector<4x6xf32>
    %119 = arith.addf %101, %109 : vector<4x1xf32>
    %120 = math.log %116 : vector<4x1xf32>
    %121 = arith.addf %119, %120 : vector<4x1xf32>
    %122 = vector.shape_cast %107 : vector<4x1xi1> to vector<4x1xi1>
    %123 = vector.broadcast %122 : vector<4x1xi1> to vector<4x6xi1>
    %124 = arith.select %123, %118, %100 : vector<4x6xi1>, vector<4x6xf32>
    %125 = arith.select %107, %121, %101 : vector<4x1xi1>, vector<4x1xf32>
    %c0_51 = arith.constant 0 : index
    %c5 = arith.constant 5 : index
    %c0_52 = arith.constant 0 : index
    %126 = vector.load %arg2[%c0_51, %c5, %c0_52] : memref<4x8x6xf32, #tpu.memory_space<vmem>>, vector<4x1x6xf32>
    %127 = vector.shape_cast %126 : vector<4x1x6xf32> to vector<4x6xf32>
    %c5_53 = arith.constant 5 : index
    %c0_54 = arith.constant 0 : index
    %c0_55 = arith.constant 0 : index
    %128 = vector.load %arg3[%c5_53, %c0_54, %c0_55] : memref<8x4x1xf32, #tpu.memory_space<vmem>>, vector<1x4x1xf32>
    %129 = vector.shape_cast %128 : vector<1x4x1xf32> to vector<4x1xf32>
    %cst_56 = arith.constant 0.000000e+00 : f32
    %130 = vector.broadcast %cst_56 : f32 to vector<4x1xf32>
    %131 = arith.cmpf one, %129, %130 : vector<4x1xf32>
    %cst_57 = arith.constant dense<0xFF800000> : vector<4xf32>
    %132 = vector.multi_reduction <maximumf>, %127, %cst_57 [1] : vector<4x6xf32> to vector<4xf32>
    %133 = vector.shape_cast %132 : vector<4xf32> to vector<4x1xf32>
    %cst_58 = arith.constant dense<0.000000e+00> : vector<4x6xf32>
    %134 = tpu.matmul %124, %3, %cst_58 {dimension_numbers = #tpu.dot_dimension_numbers<[1], [0], [0], [1], [0, 0, 1, 1], [], []>} : vector<4x6xf32>, vector<6x6xf32>, vector<4x6xf32> -> vector<4x6xf32>
    %135 = vector.broadcast %133 : vector<4x1xf32> to vector<4x6xf32>
    %136 = arith.subf %127, %135 : vector<4x6xf32>
    %137 = math.exp %136 : vector<4x6xf32>
    %138 = arith.mulf %137, %134 : vector<4x6xf32>
    %cst_59 = arith.constant dense<0xFF800000> : vector<4xf32>
    %139 = vector.multi_reduction <maximumf>, %138, %cst_59 [1] : vector<4x6xf32> to vector<4xf32>
    %140 = vector.shape_cast %139 : vector<4xf32> to vector<4x1xf32>
    %141 = vector.broadcast %140 : vector<4x1xf32> to vector<4x6xf32>
    %142 = arith.divf %138, %141 : vector<4x6xf32>
    %143 = arith.addf %125, %133 : vector<4x1xf32>
    %144 = math.log %140 : vector<4x1xf32>
    %145 = arith.addf %143, %144 : vector<4x1xf32>
    %146 = vector.shape_cast %131 : vector<4x1xi1> to vector<4x1xi1>
    %147 = vector.broadcast %146 : vector<4x1xi1> to vector<4x6xi1>
    %148 = arith.select %147, %142, %124 : vector<4x6xi1>, vector<4x6xf32>
    %149 = arith.select %131, %145, %125 : vector<4x1xi1>, vector<4x1xf32>
    %c0_60 = arith.constant 0 : index
    %c6 = arith.constant 6 : index
    %c0_61 = arith.constant 0 : index
    %150 = vector.load %arg2[%c0_60, %c6, %c0_61] : memref<4x8x6xf32, #tpu.memory_space<vmem>>, vector<4x1x6xf32>
    %151 = vector.shape_cast %150 : vector<4x1x6xf32> to vector<4x6xf32>
    %c6_62 = arith.constant 6 : index
    %c0_63 = arith.constant 0 : index
    %c0_64 = arith.constant 0 : index
    %152 = vector.load %arg3[%c6_62, %c0_63, %c0_64] : memref<8x4x1xf32, #tpu.memory_space<vmem>>, vector<1x4x1xf32>
    %153 = vector.shape_cast %152 : vector<1x4x1xf32> to vector<4x1xf32>
    %cst_65 = arith.constant 0.000000e+00 : f32
    %154 = vector.broadcast %cst_65 : f32 to vector<4x1xf32>
    %155 = arith.cmpf one, %153, %154 : vector<4x1xf32>
    %cst_66 = arith.constant dense<0xFF800000> : vector<4xf32>
    %156 = vector.multi_reduction <maximumf>, %151, %cst_66 [1] : vector<4x6xf32> to vector<4xf32>
    %157 = vector.shape_cast %156 : vector<4xf32> to vector<4x1xf32>
    %cst_67 = arith.constant dense<0.000000e+00> : vector<4x6xf32>
    %158 = tpu.matmul %148, %3, %cst_67 {dimension_numbers = #tpu.dot_dimension_numbers<[1], [0], [0], [1], [0, 0, 1, 1], [], []>} : vector<4x6xf32>, vector<6x6xf32>, vector<4x6xf32> -> vector<4x6xf32>
    %159 = vector.broadcast %157 : vector<4x1xf32> to vector<4x6xf32>
    %160 = arith.subf %151, %159 : vector<4x6xf32>
    %161 = math.exp %160 : vector<4x6xf32>
    %162 = arith.mulf %161, %158 : vector<4x6xf32>
    %cst_68 = arith.constant dense<0xFF800000> : vector<4xf32>
    %163 = vector.multi_reduction <maximumf>, %162, %cst_68 [1] : vector<4x6xf32> to vector<4xf32>
    %164 = vector.shape_cast %163 : vector<4xf32> to vector<4x1xf32>
    %165 = vector.broadcast %164 : vector<4x1xf32> to vector<4x6xf32>
    %166 = arith.divf %162, %165 : vector<4x6xf32>
    %167 = arith.addf %149, %157 : vector<4x1xf32>
    %168 = math.log %164 : vector<4x1xf32>
    %169 = arith.addf %167, %168 : vector<4x1xf32>
    %170 = vector.shape_cast %155 : vector<4x1xi1> to vector<4x1xi1>
    %171 = vector.broadcast %170 : vector<4x1xi1> to vector<4x6xi1>
    %172 = arith.select %171, %166, %148 : vector<4x6xi1>, vector<4x6xf32>
    %173 = arith.select %155, %169, %149 : vector<4x1xi1>, vector<4x1xf32>
    %c0_69 = arith.constant 0 : index
    %c7 = arith.constant 7 : index
    %c0_70 = arith.constant 0 : index
    %174 = vector.load %arg2[%c0_69, %c7, %c0_70] : memref<4x8x6xf32, #tpu.memory_space<vmem>>, vector<4x1x6xf32>
    %175 = vector.shape_cast %174 : vector<4x1x6xf32> to vector<4x6xf32>
    %c7_71 = arith.constant 7 : index
    %c0_72 = arith.constant 0 : index
    %c0_73 = arith.constant 0 : index
    %176 = vector.load %arg3[%c7_71, %c0_72, %c0_73] : memref<8x4x1xf32, #tpu.memory_space<vmem>>, vector<1x4x1xf32>
    %177 = vector.shape_cast %176 : vector<1x4x1xf32> to vector<4x1xf32>
    %cst_74 = arith.constant 0.000000e+00 : f32
    %178 = vector.broadcast %cst_74 : f32 to vector<4x1xf32>
    %179 = arith.cmpf one, %177, %178 : vector<4x1xf32>
    %cst_75 = arith.constant dense<0xFF800000> : vector<4xf32>
    %180 = vector.multi_reduction <maximumf>, %175, %cst_75 [1] : vector<4x6xf32> to vector<4xf32>
    %181 = vector.shape_cast %180 : vector<4xf32> to vector<4x1xf32>
    %cst_76 = arith.constant dense<0.000000e+00> : vector<4x6xf32>
    %182 = tpu.matmul %172, %3, %cst_76 {dimension_numbers = #tpu.dot_dimension_numbers<[1], [0], [0], [1], [0, 0, 1, 1], [], []>} : vector<4x6xf32>, vector<6x6xf32>, vector<4x6xf32> -> vector<4x6xf32>
    %183 = vector.broadcast %181 : vector<4x1xf32> to vector<4x6xf32>
    %184 = arith.subf %175, %183 : vector<4x6xf32>
    %185 = math.exp %184 : vector<4x6xf32>
    %186 = arith.mulf %185, %182 : vector<4x6xf32>
    %cst_77 = arith.constant dense<0xFF800000> : vector<4xf32>
    %187 = vector.multi_reduction <maximumf>, %186, %cst_77 [1] : vector<4x6xf32> to vector<4xf32>
    %188 = vector.shape_cast %187 : vector<4xf32> to vector<4x1xf32>
    %189 = vector.broadcast %188 : vector<4x1xf32> to vector<4x6xf32>
    %190 = arith.divf %186, %189 : vector<4x6xf32>
    %191 = arith.addf %173, %181 : vector<4x1xf32>
    %192 = math.log %188 : vector<4x1xf32>
    %193 = arith.addf %191, %192 : vector<4x1xf32>
    %194 = vector.shape_cast %179 : vector<4x1xi1> to vector<4x1xi1>
    %195 = vector.broadcast %194 : vector<4x1xi1> to vector<4x6xi1>
    %196 = arith.select %195, %190, %172 : vector<4x6xi1>, vector<4x6xf32>
    %197 = arith.select %179, %193, %173 : vector<4x1xi1>, vector<4x1xf32>
    %c0_78 = arith.constant 0 : index
    %c0_79 = arith.constant 0 : index
    %198 = vector.load %arg8[%c0_78, %c0_79] : memref<4x6xf32, #tpu.memory_space<vmem>>, vector<4x6xf32>
    tpu.vector_store %arg8[%c0_78, %c0_79], %196 {strides = array<i32>} : memref<4x6xf32, #tpu.memory_space<vmem>>, vector<4x6xf32>,
    %c0_80 = arith.constant 0 : index
    %c0_81 = arith.constant 0 : index
    %199 = vector.load %arg9[%c0_80, %c0_81] : memref<4x1xf32, #tpu.memory_space<vmem>>, vector<4x1xf32>
    tpu.vector_store %arg9[%c0_80, %c0_81], %197 {strides = array<i32>} : memref<4x1xf32, #tpu.memory_space<vmem>>, vector<4x1xf32>,
    %c0_i32_82 = arith.constant 0 : i32
    %200 = arith.cmpi eq, %arg1, %c0_i32_82 : i32
    %201 = arith.extui %200 : i1 to i32
    %c0_i32_83 = arith.constant 0 : i32
    %202 = arith.cmpi ne, %201, %c0_i32_83 : i32
    scf.if %202 {
      %c0_84 = arith.constant 0 : index
      %c0_85 = arith.constant 0 : index
      %203 = vector.load %arg6[%c0_84, %c0_85] : memref<1x6xf32, #tpu.memory_space<vmem>>, vector<1x6xf32>
      %204 = vector.broadcast %203 : vector<1x6xf32> to vector<4x6xf32>
      %205 = arith.mulf %196, %204 : vector<4x6xf32>
      %cst_86 = arith.constant dense<0.000000e+00> : vector<4xf32>
      %206 = vector.multi_reduction <add>, %205, %cst_86 [1] : vector<4x6xf32> to vector<4xf32>
      %207 = vector.shape_cast %206 : vector<4xf32> to vector<4x1xf32>
      %208 = math.log %207 : vector<4x1xf32>
      %209 = arith.addf %197, %208 : vector<4x1xf32>
      %c0_87 = arith.constant 0 : index
      %c0_88 = arith.constant 0 : index
      %210 = vector.load %arg7[%c0_87, %c0_88] : memref<4x1xf32, #tpu.memory_space<vmem>>, vector<4x1xf32>
      tpu.vector_store %arg7[%c0_87, %c0_88], %209 {strides = array<i32>} : memref<4x1xf32, #tpu.memory_space<vmem>>, vector<4x1xf32>,
    } else {
    }
    return
  }
  func.func @transform_0(%arg0: i32, %arg1: i32) -> (i32, i32, i32) {
    %c0_i32 = arith.constant 0 : i32
    %c0_i32_0 = arith.constant 0 : i32
    return %arg0, %arg1, %c0_i32 : i32, i32, i32
  }
  func.func @transform_1(%arg0: i32, %arg1: i32) -> (i32, i32, i32) {
    %c0_i32 = arith.constant 0 : i32
    %c0_i32_0 = arith.constant 0 : i32
    return %arg1, %arg0, %c0_i32 : i32, i32, i32
  }
  func.func @transform_2(%arg0: i32, %arg1: i32) -> (i32, i32) {
    %c0_i32 = arith.constant 0 : i32
    %c0_i32_0 = arith.constant 0 : i32
    %c0_i32_1 = arith.constant 0 : i32
    return %c0_i32, %c0_i32_0 : i32, i32
  }
  func.func @transform_3(%arg0: i32, %arg1: i32) -> (i32, i32) {
    %c0_i32 = arith.constant 0 : i32
    %c0_i32_0 = arith.constant 0 : i32
    %c0_i32_1 = arith.constant 0 : i32
    return %c0_i32, %c0_i32_0 : i32, i32
  }
  func.func @transform_4(%arg0: i32, %arg1: i32) -> (i32, i32) {
    %c0_i32 = arith.constant 0 : i32
    %c0_i32_0 = arith.constant 0 : i32
    %c0_i32_1 = arith.constant 0 : i32
    return %c0_i32, %c0_i32_0 : i32, i32
  }
  func.func @transform_5(%arg0: i32, %arg1: i32) -> (i32, i32) {
    %c0_i32 = arith.constant 0 : i32
    %c0_i32_0 = arith.constant 0 : i32
    return %arg0, %c0_i32 : i32, i32
  }
}

</mosaic_0001>

<bundles_post_ra>
// kernel: tpu_custom_call.1
= control target key start
LH: loop header
LB: loop body
LE: loop exit
PB: predicated region body
PF: predicated region fallthrough
CT: control target
= control target key end

     0   :  { %vm63_vm0 = vcmask 1045504   ;;  %vm2547_vm1 = vcmask 44032   ;;  %vm46_vm2 = vcmask 1041409   ;;  %vm49_vm3 = vcmask 1042434   ;;  %s2539_s2 = inlined_call_operand.vmem [shape: f32[6,6], index: 2, kind: input, shape index: {}]   ;;  %s2540_s0 = inlined_call_operand.vmem [shape: f32[4,8,6], index: 0, kind: input, shape index: {}]   ;;  %s2541_s3 = inlined_call_operand.vmem [shape: f32[1,6], index: 3, kind: input, shape index: {}]   ;;  %s2542_s1 = inlined_call_operand.vmem [shape: f32[8,4,1], index: 1, kind: input, shape index: {}]   ;;  %s2543_s4 = inlined_call_operand.vmem [shape: f32[1,6], index: 4, kind: input, shape index: {}]   ;;  %s2544_s5 = inlined_call_operand.vmem [shape: f32[4,1], index: 5, kind: output, shape index: {}]  }
   0x1   :  { %v32_v0 = vld [vmem:[%s2539_s2] sm:$0x3f]  ;;  %v36_v2 = vld [vmem:[%s2540_s0 + $0x8] sm:$0x1]  ;;  %v37_v3 = vld [vmem:[%s2540_s0 + $0x10] sm:$0x1] }
   0x2   :  { %v35_v1 = vld [vmem:[%s2540_s0] sm:$0x1]  ;;  %1505 = vmatpush.msk.msra.mxu0 %vm63_vm0, %v32_v0  ;;  %v38_v4 = vld [vmem:[%s2540_s0 + $0x18] sm:$0x1]  ;;  %v45_v5 = vrot.slane %v36_v2, 7  ;;  %vm52_vm4 = vcmask 1043459   ;;  %1508 = vmatpush.msk.msra.mxu1 %vm63_vm0, %v32_v0 }
   0x3   :  { %v48_v6 = vrot.slane %v37_v3, 6  ;;  %v51_v7 = vrot.slane %v38_v4, 5  ;;  %v1533_v8 = vld [vmem:[%s2541_s3] ss:$0 sm:$0xff]  ;;  %1511 = vmatpush.msk.msra.mxu2 %vm63_vm0, %v32_v0  ;;  %1514 = vmatpush.msk.msra.mxu3 %vm63_vm0, %v32_v0  ;;  %vm2545_vm5 = vcmask 3072   ;;  %v1681_v12 = vmov 0  }
   0x4   :  { %v47_v9 = vsel %vm46_vm2, %v45_v5, %v35_v1  ;;  %v1739_v10 = vld [vmem:[%s2542_s1] sm:$0xf]  ;;  %1517 = vmatpush.msk.msrb.mxu0 %vm63_vm0, %v32_v0  ;;  %1520 = vmatpush.msk.msrb.mxu1 %vm63_vm0, %v32_v0  ;;  %29 = vst.msk [vmem:[#allocation2] sm:$0xf] %vm2547_vm1, %v1533_v8  ;;  %v1682_v15 = vmov 0.0   ;;  %vm59_vm7 = vcmask 48128  }
   0x5   :  { %v50_v11 = vsel %vm49_vm3, %v48_v6, %v47_v9  ;;  %1530 = vset.pattern.permute.xlu1 %v1681_v12  ;;  %vm2546_vm6 = vcmp.ne.f32.partialorder %v1739_v10, 0.0  ;;  %1531 = vset.pattern.permute.xlu2 %v1681_v12  ;;  %31 = vst.msk [vmem:[#allocation3] sm:$0xf] %vm2545_vm5, %v1682_v15  ;;  %v1764_v18 = vld [vmem:[%s2540_s0 + $0x1] sm:$0x1] }
   0x6   :  { %v53_v13 = vsel %vm52_vm4, %v51_v7, %v50_v11  ;;  %v205_v14 = vsel %vm2546_vm6, 1, %v1681_v12  ;;  %1532 = vset.pattern.permute.xlu0 %v1681_v12  ;;  %1523 = vmatpush.msk.msrb.mxu2 %vm63_vm0, %v32_v0  ;;  %v1769_v19 = vld [vmem:[%s2540_s0 + $0x9] sm:$0x1]  ;;  %v1774_v20 = vld [vmem:[%s2540_s0 + $0x11] sm:$0x1] }
   0x7   :  { %v56_v16 = vsel %vm2547_vm1, %v53_v13, -inf  ;;  %207 = vperm.xlu1 %1530, %v205_v14   ;;  %1526 = vmatpush.msk.msrb.mxu3 %vm63_vm0, %v32_v0  ;;  %v1779_v21 = vld [vmem:[%s2540_s0 + $0x19] sm:$0x1]  ;;  %v234_v22 = vrot.slane %v1769_v19, 7  ;;  %v236_v23 = vrot.slane %v1774_v20, 6 }
   0x8   :  { %57 = vmax.xlane.f32.xlu0 %v56_v16  ;;  %v238_v24 = vrot.slane %v1779_v21, 5 }
   0x9   :  { %v235_v25 = vsel %vm46_vm2, %v234_v22, %v1764_v18 }
   0xa   :  { %v237_v26 = vsel %vm49_vm3, %v236_v23, %v235_v25 }
   0xb   :  { %v1757_v17 = vld [vmem:[#allocation2] sm:$0xf]  ;;  %v239_v27 = vsel %vm52_vm4, %v238_v24, %v237_v26 }
   0xc   :  { %1506 = vmatmul.msk.f32.vlgmr.msra.gmra.mxu0 %vm59_vm7, %v1757_v17  ;;  %v241_v29 = vsel %vm2547_vm1, %v239_v27, -inf }
  0x31   :  { %242 = vmax.xlane.f32.xlu1 %v241_v29 }
  0x7b   :  { %v1788_v28 = vpop.xlane.xlu0 %57 }
  0x7c   :  { %v88_v30 = vrot.slane %v1788_v28, 1  ;;  %v89_v31 = vrot.slane %v1788_v28, 2  ;;  %v90_v32 = vrot.slane %v1788_v28, 3  ;;  %v95_v33 = vsub.f32 %v35_v1, %v1788_v28 }
  0x7e   :  { %v96_v34 = vsub.f32 %v36_v2, %v88_v30  ;;  %v97_v35 = vsub.f32 %v37_v3, %v89_v31  ;;  %v98_v36 = vsub.f32 %v38_v4, %v90_v32  ;;  %v99_v40 = vmul.f32 1.442695, %v95_v33 }
  0x80   :  { %v101_v37 = vmul.f32 1.442695, %v96_v34  ;;  %v103_v38 = vmul.f32 1.442695, %v97_v35  ;;  %v105_v39 = vmul.f32 1.442695, %v98_v36 }
  0x82   :  { %1535 = vpow2.f32 %v101_v37 }
  0x83   :  { %1537 = vpow2.f32 %v103_v38 }
  0x84   :  { %1539 = vpow2.f32 %v105_v39 }
  0x85   :  { %1541 = vpow2.f32 %v99_v40 }
  0x88   :  { %v1536_v41 = vpop.eup %1535 }
  0x89   :  { %v1538_v42 = vpop.eup %1537  ;;  %v84_v44 = vpop.f32.mrf.mxu0 }
  0x8a   :  { %v1540_v43 = vpop.eup %1539  ;;  %v108_v45 = vrot.slane %v84_v44, 1  ;;  %v109_v46 = vrot.slane %v84_v44, 2  ;;  %v110_v47 = vrot.slane %v84_v44, 3 }
  0x8b   :  { %v1542_v48 = vpop.eup %1541 }
  0x8c   :  { %v1795_v49 = vmul.f32 %v1536_v41, %v108_v45  ;;  %v1797_v50 = vmul.f32 %v1538_v42, %v109_v46  ;;  %v1799_v51 = vmul.f32 %v1540_v43, %v110_v47  ;;  %v1801_v52 = vmul.f32 %v1542_v48, %v84_v44 }
  0x8e   :  { %v123_v53 = vrot.slane %v1795_v49, 7  ;;  %v125_v54 = vrot.slane %v1797_v50, 6  ;;  %v127_v56 = vrot.slane %v1799_v51, 5 }
  0x90   :  { %v124_v55 = vsel %vm46_vm2, %v123_v53, %v1801_v52 }
  0x91   :  { %v126_v57 = vsel %vm49_vm3, %v125_v54, %v124_v55 }
  0x92   :  { %v128_v58 = vsel %vm52_vm4, %v127_v56, %v126_v57 }
  0x93   :  { %v130_v59 = vsel %vm2547_vm1, %v128_v58, -inf }
  0x94   :  { %131 = vmax.xlane.f32.xlu0 %v130_v59  ;;  %v208_v59 = vpop.permute.xlu1 %207 }
 0x107   :  { %v1811_v60 = vpop.xlane.xlu0 %131 }
 0x108   :  { %v134_v61 = vrot.slane %v1811_v60, 1  ;;  %v135_v62 = vrot.slane %v1811_v60, 2  ;;  %v136_v63 = vrot.slane %v1811_v60, 3  ;;  %1543 = vrcp.f32 %v1811_v60 }
 0x109   :  { %v150_v1 = vand.u32 2147483647, %v1811_v60  ;;  %v152_v2 = vand.u32 2147483648, %v1811_v60  ;;  %vm146_vm8 = vweird.f32 %v1811_v60 }
 0x10a   :  { %1545 = vrcp.f32 %v134_v61  ;;  %vm161_vm9 = vweird.f32 %v134_v61  ;;  %v165_v8 = vand.u32 2147483647, %v134_v61  ;;  %v167_v14 = vand.u32 2147483648, %v134_v61 }
 0x10b   :  { %1547 = vrcp.f32 %v135_v62  ;;  %vm1821_vm10 = vcmp.eq.f32.partialorder %v150_v1, 8.507059e+37  ;;  %v153_v13 = vor.u32 1.1754944e-38, %v152_v2  ;;  %vm176_vm12 = vweird.f32 %v135_v62 }
 0x10c   :  { %1549 = vrcp.f32 %v136_v63  ;;  %v180_v25 = vand.u32 2147483647, %v135_v62  ;;  %v182_v26 = vand.u32 2147483648, %v135_v62  ;;  %v195_v33 = vand.u32 2147483647, %v136_v63 }
 0x10d   :  { %v197_v34 = vand.u32 2147483648, %v136_v63  ;;  %vm166_vm6 = vcmp.eq.f32.partialorder %v165_v8, 8.507059e+37  ;;  %v168_v38 = vor.u32 1.1754944e-38, %v167_v14  ;;  %vm191_vm1 = vweird.f32 %v136_v63 }
 0x10e   :  { %v1544_v0 = vpop.eup %1543  ;;  %v183_v41 = vor.u32 1.1754944e-38, %v182_v26 }
 0x10f   :  { %v142_v3 = vmul.f32 %v1544_v0, %v1811_v60  ;;  %vm147_vm11 = vweird.f32 %v1544_v0  ;;  %v198_v46 = vor.u32 1.1754944e-38, %v197_v34 }
 0x110   :  { %v1546_v4 = vpop.eup %1545  ;;  %vm1827_vm14 = vmor %vm146_vm8, %vm147_vm11  ;;  %vm181_vm11 = vcmp.eq.f32.partialorder %v180_v25, 8.507059e+37 }
 0x111   :  { %v1548_v5 = vpop.eup %1547  ;;  %v143_v6 = vsub.f32 1.0, %v142_v3  ;;  %v157_v7 = vmul.f32 %v1546_v4, %v134_v61  ;;  %vm162_vm13 = vweird.f32 %v1546_v4  ;;  %v1870_v3 = vld [vmem:[%s2540_s0 + $0x1a] sm:$0x1] }
 0x112   :  { %v1550_v9 = vpop.eup %1549  ;;  %v172_v15 = vmul.f32 %v1548_v5, %v135_v62  ;;  %vm177_vm15 = vweird.f32 %v1548_v5  ;;  %vm163_vm5 = vmor %vm161_vm9, %vm162_vm13  ;;  %vm196_vm9 = vcmp.eq.f32.partialorder %v195_v33, 8.507059e+37 }
 0x113   :  { %v144_v16 = vmul.f32 %v1544_v0, %v143_v6  ;;  %v158_v22 = vsub.f32 1.0, %v157_v7  ;;  %v187_v23 = vmul.f32 %v1550_v9, %v136_v63  ;;  %vm192_vm0 = vweird.f32 %v1550_v9  ;;  %vm178_vm8 = vmor %vm176_vm12, %vm177_vm15 }
 0x114   :  { %v173_v24 = vsub.f32 1.0, %v172_v15  ;;  %v418_v7 = vrot.slane %v1870_v3, 5 }
 0x115   :  { %v145_v27 = vadd.f32 %v1544_v0, %v144_v16  ;;  %v159_v29 = vmul.f32 %v1546_v4, %v158_v22  ;;  %v188_v30 = vsub.f32 1.0, %v187_v23 }
 0x116   :  { %v174_v32 = vmul.f32 %v1548_v5, %v173_v24 }
 0x117   :  { %v149_v35 = vsel %vm1827_vm14, %v1544_v0, %v145_v27  ;;  %v160_v36 = vadd.f32 %v1546_v4, %v159_v29  ;;  %v189_v37 = vmul.f32 %v1550_v9, %v188_v30  ;;  %vm193_vm14 = vmor %vm191_vm1, %vm192_vm0  ;;  %vm2556_vm1 = vcmask 44032  }
 0x118   :  { %v175_v39 = vadd.f32 %v1548_v5, %v174_v32  ;;  %v154_v43 = vsel %vm1821_vm10, %v153_v13, %v149_v35 }
 0x119   :  { %v164_v40 = vsel %vm163_vm5, %v1546_v4, %v160_v36  ;;  %v190_v42 = vadd.f32 %v1550_v9, %v189_v37  ;;  %v155_v56 = vmul.f32 %v154_v43, %v1801_v52  ;;  %vm209_vm5 = vcmp.eq.s32.totalorder %v208_v59, 1  ;;  %v1859_v52 = vld [vmem:[%s2540_s0 + $0xa] sm:$0x1] }
 0x11a   :  { %v169_v44 = vsel %vm166_vm6, %v168_v38, %v164_v40  ;;  %v179_v45 = vsel %vm178_vm8, %v1548_v5, %v175_v39  ;;  %v414_v4 = vrot.slane %v1859_v52, 7  ;;  %vm2557_vm6 = vmmov %vm2556_vm1 }
 0x11b   :  { %v170_v47 = vmul.f32 %v169_v44, %v1795_v49  ;;  %v184_v48 = vsel %vm181_vm11, %v183_v41, %v179_v45  ;;  %v194_v53 = vsel %vm193_vm14, %v1550_v9, %v190_v42  ;;  %v1906_v44 = vld [vmem:[%s2542_s1 + $0x4] sm:$0xf] }
 0x11c   :  { %v185_v54 = vmul.f32 %v184_v48, %v1797_v50  ;;  %v199_v55 = vsel %vm196_vm9, %v198_v46, %v194_v53  ;;  %v1849_v50 = vpop.xlane.xlu1 %242  ;;  %vm2548_vm10 = vcmp.ne.f32.partialorder %v1906_v44, 0.0 }
 0x11d   :  { %v200_v57 = vmul.f32 %v199_v55, %v1799_v51  ;;  %v214_v58 = vrot.slane %v170_v47, 7  ;;  %v1854_v51 = vld [vmem:[%s2540_s0 + $0x2] sm:$0x1]  ;;  %v268_v2 = vrot.slane %v1849_v50, 1  ;;  %v269_v6 = vrot.slane %v1849_v50, 2 }
 0x11e   :  { %v216_v61 = vrot.slane %v185_v54, 6  ;;  %v270_v8 = vrot.slane %v1849_v50, 3  ;;  %v415_v9 = vsel %vm46_vm2, %v414_v4, %v1854_v51  ;;  %v275_v23 = vsub.f32 %v1764_v18, %v1849_v50 }
 0x11f   :  { %v215_v62 = vsel %vm46_vm2, %v214_v58, %v155_v56  ;;  %v218_v63 = vrot.slane %v200_v57, 5  ;;  %v276_v13 = vsub.f32 %v1769_v19, %v268_v2  ;;  %v277_v15 = vsub.f32 %v1774_v20, %v269_v6 }
 0x120   :  { %v217_v0 = vsel %vm49_vm3, %v216_v61, %v215_v62  ;;  %v278_v22 = vsub.f32 %v1779_v21, %v270_v8  ;;  %v279_v27 = vmul.f32 1.442695, %v275_v23  ;;  %v385_v45 = vsel %vm2548_vm10, 1, %v1681_v12 }
 0x121   :  { %v219_v49 = vsel %vm52_vm4, %v218_v63, %v217_v0  ;;  %v281_v24 = vmul.f32 1.442695, %v276_v13  ;;  %v283_v25 = vmul.f32 1.442695, %v277_v15 }
 0x122   :  { %v1845_v1 = vsel %vm209_vm5, %v219_v49, %v1757_v17  ;;  %v1864_v17 = vld [vmem:[%s2540_s0 + $0x12] sm:$0x1]  ;;  %v285_v26 = vmul.f32 1.442695, %v278_v22 }
 0x123   :  { %1509 = vmatmul.msk.f32.vlgmr.msra.gmra.mxu1 %vm59_vm7, %v1845_v1  ;;  %v416_v5 = vrot.slane %v1864_v17, 6  ;;  %1551 = vpow2.f32 %v281_v24 }
 0x124   :  { %1553 = vpow2.f32 %v283_v25 }
 0x125   :  { %v417_v11 = vsel %vm49_vm3, %v416_v5, %v415_v9  ;;  %1555 = vpow2.f32 %v285_v26 }
 0x126   :  { %v419_v14 = vsel %vm52_vm4, %v418_v7, %v417_v11  ;;  %1557 = vpow2.f32 %v279_v27 }
 0x127   :  { %v421_v16 = vsel %vm2556_vm1, %v419_v14, -inf }
 0x128   :  { %422 = vmax.xlane.f32.xlu0 %v421_v16 }
 0x129   :  { %v1552_v19 = vpop.eup %1551 }
 0x12a   :  { %v1554_v29 = vpop.eup %1553 }
 0x12b   :  { %v1556_v30 = vpop.eup %1555 }
 0x12c   :  { %v1558_v21 = vpop.eup %1557 }
 0x1a0   :  { %v264_v20 = vpop.f32.mrf.mxu1 }
 0x1a1   :  { %v288_v31 = vrot.slane %v264_v20, 1  ;;  %v289_v32 = vrot.slane %v264_v20, 2  ;;  %v290_v33 = vrot.slane %v264_v20, 3  ;;  %v1893_v36 = vmul.f32 %v1558_v21, %v264_v20 }
 0x1a3   :  { %v1887_v34 = vmul.f32 %v1552_v19, %v288_v31  ;;  %v1889_v35 = vmul.f32 %v1554_v29, %v289_v32  ;;  %v1891_v18 = vmul.f32 %v1556_v30, %v290_v33 }
 0x1a5   :  { %v303_v37 = vrot.slane %v1887_v34, 7  ;;  %v305_v38 = vrot.slane %v1889_v35, 6  ;;  %v307_v40 = vrot.slane %v1891_v18, 5 }
 0x1a7   :  { %v304_v39 = vsel %vm46_vm2, %v303_v37, %v1893_v36 }
 0x1a8   :  { %v306_v41 = vsel %vm49_vm3, %v305_v38, %v304_v39 }
 0x1a9   :  { %v308_v42 = vsel %vm52_vm4, %v307_v40, %v306_v41 }
 0x1aa   :  { %v310_v43 = vsel %vm2557_vm6, %v308_v42, -inf }
 0x1ab   :  { %311 = vmax.xlane.f32.xlu2 %v310_v43 }
 0x1c3   :  { %387 = vperm.xlu2 %1531, %v385_v45  }
 0x21e   :  { %v1912_v46 = vpop.xlane.xlu2 %311 }
 0x21f   :  { %v314_v47 = vrot.slane %v1912_v46, 1  ;;  %v315_v48 = vrot.slane %v1912_v46, 2  ;;  %v316_v53 = vrot.slane %v1912_v46, 3  ;;  %1559 = vrcp.f32 %v1912_v46 }
 0x220   :  { %v330_v55 = vand.u32 2147483647, %v1912_v46  ;;  %v332_v56 = vand.u32 2147483648, %v1912_v46  ;;  %vm326_vm12 = vweird.f32 %v1912_v46 }
 0x221   :  { %1561 = vrcp.f32 %v314_v47  ;;  %vm341_vm13 = vweird.f32 %v314_v47  ;;  %v345_v63 = vand.u32 2147483647, %v314_v47  ;;  %v347_v4 = vand.u32 2147483648, %v314_v47 }
 0x222   :  { %1563 = vrcp.f32 %v315_v48  ;;  %vm1922_vm15 = vcmp.eq.f32.partialorder %v330_v55, 8.507059e+37  ;;  %v333_v2 = vor.u32 1.1754944e-38, %v332_v56  ;;  %vm356_vm8 = vweird.f32 %v315_v48 }
 0x223   :  { %1565 = vrcp.f32 %v316_v53  ;;  %v360_v11 = vand.u32 2147483647, %v315_v48  ;;  %v362_v13 = vand.u32 2147483648, %v315_v48  ;;  %v375_v24 = vand.u32 2147483647, %v316_v53 }
 0x224   :  { %v377_v25 = vand.u32 2147483648, %v316_v53  ;;  %vm346_vm6 = vcmp.eq.f32.partialorder %v345_v63, 8.507059e+37  ;;  %v348_v29 = vor.u32 1.1754944e-38, %v347_v4  ;;  %vm371_vm10 = vweird.f32 %v316_v53 }
 0x225   :  { %v1560_v54 = vpop.eup %1559  ;;  %v363_v31 = vor.u32 1.1754944e-38, %v362_v13 }
 0x226   :  { %v322_v57 = vmul.f32 %v1560_v54, %v1912_v46  ;;  %vm327_vm0 = vweird.f32 %v1560_v54  ;;  %v378_v38 = vor.u32 1.1754944e-38, %v377_v25  ;;  %v388_v42 = vpop.permute.xlu2 %387 }
 0x227   :  { %v1562_v58 = vpop.eup %1561  ;;  %vm1928_vm14 = vmor %vm326_vm12, %vm327_vm0  ;;  %vm361_vm0 = vcmp.eq.f32.partialorder %v360_v11, 8.507059e+37 }
 0x228   :  { %v1564_v59 = vpop.eup %1563  ;;  %v323_v61 = vsub.f32 1.0, %v322_v57  ;;  %v337_v62 = vmul.f32 %v1562_v58, %v314_v47  ;;  %vm342_vm11 = vweird.f32 %v1562_v58 }
 0x229   :  { %v1566_v0 = vpop.eup %1565  ;;  %v352_v5 = vmul.f32 %v1564_v59, %v315_v48  ;;  %vm357_vm9 = vweird.f32 %v1564_v59  ;;  %vm343_vm1 = vmor %vm341_vm13, %vm342_vm11  ;;  %vm376_vm13 = vcmp.eq.f32.partialorder %v375_v24, 8.507059e+37 }
 0x22a   :  { %v324_v6 = vmul.f32 %v1560_v54, %v323_v61  ;;  %v338_v7 = vsub.f32 1.0, %v337_v62  ;;  %v367_v8 = vmul.f32 %v1566_v0, %v316_v53  ;;  %vm372_vm5 = vweird.f32 %v1566_v0  ;;  %vm358_vm12 = vmor %vm356_vm8, %vm357_vm9  ;;  %v1971_v61 = vld [vmem:[%s2540_s0 + $0x1b] sm:$0x1] }
 0x22b   :  { %v353_v9 = vsub.f32 1.0, %v352_v5  ;;  %v598_v49 = vrot.slane %v1971_v61, 5 }
 0x22c   :  { %v325_v14 = vadd.f32 %v1560_v54, %v324_v6  ;;  %v339_v15 = vmul.f32 %v1562_v58, %v338_v7  ;;  %v368_v16 = vsub.f32 1.0, %v367_v8 }
 0x22d   :  { %v354_v23 = vmul.f32 %v1564_v59, %v353_v9 }
 0x22e   :  { %v329_v26 = vsel %vm1928_vm14, %v1560_v54, %v325_v14  ;;  %v340_v27 = vadd.f32 %v1562_v58, %v339_v15  ;;  %v369_v19 = vmul.f32 %v1566_v0, %v368_v16  ;;  %vm373_vm14 = vmor %vm371_vm10, %vm372_vm5  ;;  %vm2562_vm10 = vcmask 44032  }
 0x22f   :  { %v355_v30 = vadd.f32 %v1564_v59, %v354_v23  ;;  %v334_v33 = vsel %vm1922_vm15, %v333_v2, %v329_v26  ;;  %vm389_vm15 = vcmp.eq.s32.totalorder %v388_v42, 1  ;;  %vm2563_vm8 = vmmov %vm2562_vm10  ;;  %v2021_v42 = vld [vmem:[%s2540_s0 + $0x14] sm:$0x1] }
 0x230   :  { %v344_v20 = vsel %vm343_vm1, %v1562_v58, %v340_v27  ;;  %v370_v32 = vadd.f32 %v1566_v0, %v369_v19  ;;  %v335_v47 = vmul.f32 %v334_v33, %v1893_v36  ;;  %v1960_v36 = vld [vmem:[%s2540_s0 + $0xb] sm:$0x1]  ;;  %vm2564_vm9 = vmmov %vm2563_vm8 }
 0x231   :  { %v349_v21 = vsel %vm346_vm6, %v348_v29, %v344_v20  ;;  %v359_v37 = vsel %vm358_vm12, %v1564_v59, %v355_v30  ;;  %v594_v62 = vrot.slane %v1960_v36, 7  ;;  %vm2565_vm6 = vcmp.ne.f32.partialorder %v1739_v10, 0.0 }
 0x232   :  { %v350_v39 = vmul.f32 %v349_v21, %v1887_v34  ;;  %v364_v40 = vsel %vm361_vm0, %v363_v31, %v359_v37  ;;  %v374_v41 = vsel %vm373_vm14, %v1566_v0, %v370_v32  ;;  %vm2566_vm12 = vcmp.ne.f32.partialorder %v1906_v44, 0.0 }
 0x233   :  { %v365_v43 = vmul.f32 %v364_v40, %v1889_v35  ;;  %v379_v45 = vsel %vm376_vm13, %v378_v38, %v374_v41  ;;  %v1950_v35 = vpop.xlane.xlu0 %422  ;;  %v2016_v41 = vld [vmem:[%s2540_s0 + $0xc] sm:$0x1] }
 0x234   :  { %v380_v48 = vmul.f32 %v379_v45, %v1891_v18  ;;  %v394_v53 = vrot.slane %v350_v39, 7  ;;  %v1955_v18 = vld [vmem:[%s2540_s0 + $0x3] sm:$0x1]  ;;  %v448_v59 = vrot.slane %v1950_v35, 1  ;;  %v449_v0 = vrot.slane %v1950_v35, 2 }
 0x235   :  { %v396_v54 = vrot.slane %v365_v43, 6  ;;  %v450_v2 = vrot.slane %v1950_v35, 3  ;;  %v595_v4 = vsel %vm46_vm2, %v594_v62, %v1955_v18  ;;  %v455_v13 = vsub.f32 %v1854_v51, %v1950_v35  ;;  %v2007_v39 = vld [vmem:[%s2542_s1 + $0x8] sm:$0xf]  ;;  %v2027_v45 = vld [vmem:[%s2540_s0 + $0x4] sm:$0x1] }
 0x236   :  { %v395_v55 = vsel %vm46_vm2, %v394_v53, %v335_v47  ;;  %v398_v56 = vrot.slane %v380_v48, 5  ;;  %v456_v6 = vsub.f32 %v1859_v52, %v448_v59  ;;  %v457_v8 = vsub.f32 %v1864_v17, %v449_v0  ;;  %v2032_v47 = vld [vmem:[%s2540_s0 + $0x1c] sm:$0x1]  ;;  %v2053_v62 = vld [vmem:[%s2542_s1 + $0x18] sm:$0xf] }
 0x237   :  { %v397_v57 = vsel %vm49_vm3, %v396_v54, %v395_v55  ;;  %v458_v11 = vsub.f32 %v1870_v3, %v450_v2  ;;  %v459_v22 = vmul.f32 1.442695, %v455_v13  ;;  %vm409_vm11 = vcmp.ne.f32.partialorder %v2007_v39, 0.0 }
 0x238   :  { %v399_v34 = vsel %vm52_vm4, %v398_v56, %v397_v57  ;;  %v461_v14 = vmul.f32 1.442695, %v456_v6  ;;  %v463_v15 = vmul.f32 1.442695, %v457_v8  ;;  %v565_v40 = vsel %vm409_vm11, 1, %v1681_v12 }
 0x239   :  { %v1946_v58 = vsel %vm389_vm15, %v399_v34, %v1845_v1  ;;  %v1965_v1 = vld [vmem:[%s2540_s0 + $0x13] sm:$0x1]  ;;  %v465_v16 = vmul.f32 1.442695, %v458_v11  ;;  %v774_v43 = vrot.slane %v2016_v41, 7  ;;  %v776_v48 = vrot.slane %v2021_v42, 6 }
 0x23a   :  { %1512 = vmatmul.msk.f32.vlgmr.msra.gmra.mxu2 %vm59_vm7, %v1946_v58  ;;  %v596_v63 = vrot.slane %v1965_v1, 6  ;;  %1567 = vpow2.f32 %v461_v14  ;;  %v778_v54 = vrot.slane %v2032_v47, 5  ;;  %v2044_v34 = vld [vmem:[%s2542_s1 + $0x14] sm:$0xf]  ;;  %vm2549_vm1 = vcmp.ne.f32.partialorder %v2053_v62, 0.0 }
 0x23b   :  { %1569 = vpow2.f32 %v463_v15  ;;  %v775_v53 = vsel %vm46_vm2, %v774_v43, %v2027_v45  ;;  %vm2550_vm5 = vcmp.ne.f32.partialorder %v2044_v34, 0.0 }
 0x23c   :  { %v597_v5 = vsel %vm49_vm3, %v596_v63, %v595_v4  ;;  %1571 = vpow2.f32 %v465_v16  ;;  %v777_v55 = vsel %vm49_vm3, %v776_v48, %v775_v53  ;;  %v1105_v59 = vsel %vm2550_vm5, 1, %v1681_v12 }
 0x23d   :  { %v599_v7 = vsel %vm52_vm4, %v598_v49, %v597_v5  ;;  %1573 = vpow2.f32 %v459_v22  ;;  %v779_v56 = vsel %vm52_vm4, %v778_v54, %v777_v55  ;;  %v1285_v63 = vsel %vm2549_vm1, 1, %v1681_v12  ;;  %v34_v49 = vld [vmem:[#allocation3] sm:$0xf] }
 0x23e   :  { %v601_v9 = vsel %vm2562_vm10, %v599_v7, -inf  ;;  %v781_v57 = vsel %vm2564_vm9, %v779_v56, -inf  ;;  %1575 = vlog2.f32 %v1811_v60  ;;  %v201_v4 = vadd.f32 %v1788_v28, %v34_v49 }
 0x23f   :  { %602 = vmax.xlane.f32.xlu2 %v601_v9  ;;  %1577 = vlog2.f32 %v1912_v46 }
 0x240   :  { %v1568_v52 = vpop.eup %1567 }
 0x241   :  { %v1570_v23 = vpop.eup %1569 }
 0x242   :  { %v1572_v24 = vpop.eup %1571 }
 0x243   :  { %v1574_v3 = vpop.eup %1573 }
 0x244   :  { %v1576_v0 = vpop.eup %1575 }
 0x245   :  { %v203_v2 = vmul.f32 0.6931472, %v1576_v0  ;;  %v1578_v6 = vpop.eup %1577 }
 0x246   :  { %v383_v8 = vmul.f32 0.6931472, %v1578_v6 }
 0x247   :  { %v204_v5 = vadd.f32 %v203_v2, %v201_v4 }
 0x249   :  { %v222_v7 = vsel %vm2565_vm6, %v204_v5, %v34_v49 }
 0x24a   :  { %v381_v9 = vadd.f32 %v1849_v50, %v222_v7 }
 0x24c   :  { %v384_v11 = vadd.f32 %v383_v8, %v381_v9 }
 0x24e   :  { %v402_v28 = vsel %vm2566_vm12, %v384_v11, %v222_v7 }
 0x24f   :  { %v561_v50 = vadd.f32 %v1950_v35, %v402_v28 }
 0x2bd   :  { %v444_v17 = vpop.f32.mrf.mxu2 }
 0x2be   :  { %v468_v25 = vrot.slane %v444_v17, 1  ;;  %v469_v26 = vrot.slane %v444_v17, 2  ;;  %v470_v27 = vrot.slane %v444_v17, 3  ;;  %v1994_v30 = vmul.f32 %v1574_v3, %v444_v17 }
 0x2c0   :  { %v1988_v19 = vmul.f32 %v1568_v52, %v468_v25  ;;  %v1990_v29 = vmul.f32 %v1570_v23, %v469_v26  ;;  %v1992_v51 = vmul.f32 %v1572_v24, %v470_v27 }
 0x2c2   :  { %v483_v20 = vrot.slane %v1988_v19, 7  ;;  %v485_v31 = vrot.slane %v1990_v29, 6  ;;  %v487_v33 = vrot.slane %v1992_v51, 5 }
 0x2c4   :  { %v484_v32 = vsel %vm46_vm2, %v483_v20, %v1994_v30 }
 0x2c5   :  { %v486_v21 = vsel %vm49_vm3, %v485_v31, %v484_v32 }
 0x2c6   :  { %v488_v37 = vsel %vm52_vm4, %v487_v33, %v486_v21 }
 0x2c7   :  { %v490_v38 = vsel %vm2563_vm8, %v488_v37, -inf }
 0x2c8   :  { %491 = vmax.xlane.f32.xlu0 %v490_v38 }
 0x2dc   :  { %567 = vperm.xlu0 %1532, %v565_v40  }
 0x306   :  { %782 = vmax.xlane.f32.xlu0 %v781_v57 }
 0x31a   :  { %1107 = vperm.xlu0 %1532, %v1105_v59  }
 0x322   :  { %1287 = vperm.xlu0 %1532, %v1285_v63  }
 0x33b   :  { %v492_v13 = vpop.xlane.xlu0 %491 }
 0x33c   :  { %v494_v14 = vrot.slane %v492_v13, 1  ;;  %v495_v15 = vrot.slane %v492_v13, 2  ;;  %v2065_v60 = vrot.slane %v492_v13, 3  ;;  %1579 = vrcp.f32 %v492_v13 }
 0x33d   :  { %1581 = vlog2.f32 %v492_v13  ;;  %v510_v10 = vand.u32 2147483647, %v492_v13  ;;  %v512_v16 = vand.u32 2147483648, %v492_v13  ;;  %vm506_vm0 = vweird.f32 %v492_v13 }
 0x33e   :  { %1583 = vrcp.f32 %v494_v14  ;;  %vm521_vm14 = vweird.f32 %v494_v14  ;;  %v525_v17 = vand.u32 2147483647, %v494_v14  ;;  %v527_v3 = vand.u32 2147483648, %v494_v14 }
 0x33f   :  { %1585 = vrcp.f32 %v495_v15  ;;  %vm2071_vm13 = vcmp.eq.f32.partialorder %v510_v10, 8.507059e+37  ;;  %v513_v32 = vor.u32 1.1754944e-38, %v512_v16  ;;  %vm536_vm15 = vweird.f32 %v495_v15 }
 0x340   :  { %1587 = vrcp.f32 %v2065_v60  ;;  %v540_v43 = vand.u32 2147483647, %v495_v15  ;;  %v542_v48 = vand.u32 2147483648, %v495_v15  ;;  %v555_v59 = vand.u32 2147483647, %v2065_v60 }
 0x341   :  { %v557_v39 = vand.u32 2147483648, %v2065_v60  ;;  %vm526_vm1 = vcmp.eq.f32.partialorder %v525_v17, 8.507059e+37  ;;  %v528_v2 = vor.u32 1.1754944e-38, %v527_v3 }
 0x342   :  { %v1580_v46 = vpop.eup %1579  ;;  %vm541_vm5 = vcmp.eq.f32.partialorder %v540_v43, 8.507059e+37  ;;  %v543_v6 = vor.u32 1.1754944e-38, %v542_v48 }
 0x343   :  { %v1582_v22 = vpop.eup %1581  ;;  %v502_v52 = vmul.f32 %v1580_v46, %v492_v13  ;;  %vm507_vm10 = vweird.f32 %v1580_v46  ;;  %v558_v13 = vor.u32 1.1754944e-38, %v557_v39 }
 0x344   :  { %v1584_v23 = vpop.eup %1583  ;;  %v563_v24 = vmul.f32 0.6931472, %v1582_v22  ;;  %vm2081_vm9 = vmor %vm506_vm0, %vm507_vm10  ;;  %vm551_vm0 = vweird.f32 %v2065_v60 }
 0x345   :  { %v1586_v25 = vpop.eup %1585  ;;  %v503_v26 = vsub.f32 1.0, %v502_v52  ;;  %v517_v44 = vmul.f32 %v1584_v23, %v494_v14  ;;  %vm522_vm8 = vweird.f32 %v1584_v23 }
 0x346   :  { %v1588_v20 = vpop.eup %1587  ;;  %v564_v31 = vadd.f32 %v563_v24, %v561_v50  ;;  %v532_v33 = vmul.f32 %v1586_v25, %v495_v15  ;;  %vm537_vm6 = vweird.f32 %v1586_v25  ;;  %vm523_vm12 = vmor %vm521_vm14, %vm522_vm8  ;;  %vm556_vm14 = vcmp.eq.f32.partialorder %v555_v59, 8.507059e+37 }
 0x347   :  { %v504_v35 = vmul.f32 %v1580_v46, %v503_v26  ;;  %v518_v21 = vsub.f32 1.0, %v517_v44  ;;  %v547_v37 = vmul.f32 %v1588_v20, %v2065_v60  ;;  %vm538_vm10 = vmor %vm536_vm15, %vm537_vm6 }
 0x348   :  { %v2078_v38 = vsel %vm409_vm11, %v564_v31, %v402_v28  ;;  %v533_v40 = vsub.f32 1.0, %v532_v33  ;;  %vm552_vm11 = vweird.f32 %v1588_v20 }
 0x349   :  { %v505_v53 = vadd.f32 %v1580_v46, %v504_v35  ;;  %v519_v54 = vmul.f32 %v1584_v23, %v518_v21  ;;  %v548_v55 = vsub.f32 1.0, %v547_v37 }
 0x34a   :  { %v534_v57 = vmul.f32 %v1586_v25, %v533_v40 }
 0x34b   :  { %v509_v63 = vsel %vm2081_vm9, %v1580_v46, %v505_v53  ;;  %v520_v0 = vadd.f32 %v1584_v23, %v519_v54  ;;  %v549_v49 = vmul.f32 %v1588_v20, %v548_v55  ;;  %vm553_vm9 = vmor %vm551_vm0, %vm552_vm11 }
 0x34c   :  { %v535_v4 = vadd.f32 %v1586_v25, %v534_v57  ;;  %v514_v8 = vsel %vm2071_vm13, %v513_v32, %v509_v63 }
 0x34d   :  { %v524_v5 = vsel %vm523_vm12, %v1584_v23, %v520_v0  ;;  %v550_v7 = vadd.f32 %v1588_v20, %v549_v49  ;;  %v515_v16 = vmul.f32 %v514_v8, %v1994_v30  ;;  %v1513_v49 = vld [vmem:[%s2542_s1 + $0xc] sm:$0xf] }
 0x34e   :  { %v529_v9 = vsel %vm526_vm1, %v528_v2, %v524_v5  ;;  %v539_v11 = vsel %vm538_vm10, %v1586_v25, %v535_v4  ;;  %v568_v46 = vpop.permute.xlu0 %567  ;;  %vm589_vm1 = vcmp.ne.f32.partialorder %v1513_v49, 0.0 }
 0x34f   :  { %v530_v14 = vmul.f32 %v529_v9, %v1988_v19  ;;  %v544_v28 = vsel %vm541_vm5, %v543_v6, %v539_v11  ;;  %v554_v10 = vsel %vm553_vm9, %v1588_v20, %v550_v7  ;;  %vm569_vm13 = vcmp.eq.s32.totalorder %v568_v46, 1 }
 0x350   :  { %v545_v60 = vmul.f32 %v544_v28, %v1990_v29  ;;  %v559_v15 = vsel %vm556_vm14, %v558_v13, %v554_v10  ;;  %v603_v29 = vpop.xlane.xlu2 %602  ;;  %vm2571_vm5 = vcmask 44032   ;;  %v745_v2 = vsel %vm589_vm1, 1, %v1681_v12 }
 0x351   :  { %v560_v22 = vmul.f32 %v559_v15, %v1992_v51  ;;  %v574_v50 = vrot.slane %v530_v14, 7  ;;  %v628_v30 = vrot.slane %v603_v29, 1  ;;  %v629_v26 = vrot.slane %v603_v29, 2 }
 0x352   :  { %v576_v52 = vrot.slane %v545_v60, 6  ;;  %v630_v51 = vrot.slane %v603_v29, 3  ;;  %v635_v20 = vsub.f32 %v1955_v18, %v603_v29  ;;  %v741_v14 = vadd.f32 %v603_v29, %v2078_v38 }
 0x353   :  { %v575_v23 = vsel %vm46_vm2, %v574_v50, %v515_v16  ;;  %v578_v24 = vrot.slane %v560_v22, 5  ;;  %v636_v27 = vsub.f32 %v1960_v36, %v628_v30  ;;  %v637_v44 = vsub.f32 %v1965_v1, %v629_v26 }
 0x354   :  { %v577_v17 = vsel %vm49_vm3, %v576_v52, %v575_v23  ;;  %v638_v3 = vsub.f32 %v1971_v61, %v630_v51 }
 0x355   :  { %v579_v19 = vsel %vm52_vm4, %v578_v24, %v577_v17  ;;  %v641_v31 = vmul.f32 1.442695, %v636_v27  ;;  %v643_v32 = vmul.f32 1.442695, %v637_v44 }
 0x356   :  { %v2102_v25 = vsel %vm569_vm13, %v579_v19, %v1946_v58  ;;  %v645_v33 = vmul.f32 1.442695, %v638_v3  ;;  %v639_v58 = vmul.f32 1.442695, %v635_v20 }
 0x357   :  { %1515 = vmatmul.msk.f32.vlgmr.msra.gmra.mxu3 %vm59_vm7, %v2102_v25  ;;  %1589 = vpow2.f32 %v641_v31 }
 0x358   :  { %1591 = vpow2.f32 %v643_v32 }
 0x359   :  { %1593 = vpow2.f32 %v645_v33 }
 0x35a   :  { %1595 = vpow2.f32 %v639_v58 }
 0x35d   :  { %v1590_v35 = vpop.eup %1589 }
 0x35e   :  { %v1592_v21 = vpop.eup %1591 }
 0x35f   :  { %v1594_v37 = vpop.eup %1593 }
 0x360   :  { %v1596_v1 = vpop.eup %1595 }
 0x3da   :  { %v624_v40 = vpop.f32.mrf.mxu3 }
 0x3db   :  { %v648_v43 = vrot.slane %v624_v40, 1  ;;  %v649_v36 = vrot.slane %v624_v40, 2  ;;  %v650_v48 = vrot.slane %v624_v40, 3  ;;  %v2116_v54 = vmul.f32 %v1596_v1, %v624_v40 }
 0x3dd   :  { %v2110_v53 = vmul.f32 %v1590_v35, %v648_v43  ;;  %v2112_v61 = vmul.f32 %v1592_v21, %v649_v36  ;;  %v2114_v18 = vmul.f32 %v1594_v37, %v650_v48 }
 0x3df   :  { %v663_v55 = vrot.slane %v2110_v53, 7  ;;  %v665_v56 = vrot.slane %v2112_v61, 6  ;;  %v667_v59 = vrot.slane %v2114_v18, 5 }
 0x3e1   :  { %v664_v57 = vsel %vm46_vm2, %v663_v55, %v2116_v54 }
 0x3e2   :  { %v666_v39 = vsel %vm49_vm3, %v665_v56, %v664_v57 }
 0x3e3   :  { %v668_v63 = vsel %vm52_vm4, %v667_v59, %v666_v39 }
 0x3e4   :  { %v670_v0 = vsel %vm2571_vm5, %v668_v63, -inf }
 0x3e5   :  { %671 = vmax.xlane.f32.xlu1 %v670_v0 }
 0x3fe   :  { %747 = vperm.xlu1 %1530, %v745_v2  }
 0x458   :  { %v672_v4 = vpop.xlane.xlu1 %671 }
 0x459   :  { %v674_v5 = vrot.slane %v672_v4, 1  ;;  %v675_v6 = vrot.slane %v672_v4, 2  ;;  %v2131_v7 = vrot.slane %v672_v4, 3  ;;  %1597 = vrcp.f32 %v672_v4 }
 0x45a   :  { %1599 = vlog2.f32 %v672_v4  ;;  %v690_v8 = vand.u32 2147483647, %v672_v4  ;;  %v692_v11 = vand.u32 2147483648, %v672_v4  ;;  %vm686_vm15 = vweird.f32 %v672_v4 }
 0x45b   :  { %1601 = vrcp.f32 %v674_v5  ;;  %vm701_vm8 = vweird.f32 %v674_v5  ;;  %v705_v46 = vand.u32 2147483647, %v674_v5  ;;  %v707_v52 = vand.u32 2147483648, %v674_v5 }
 0x45c   :  { %1603 = vrcp.f32 %v675_v6  ;;  %vm2135_vm6 = vcmp.eq.f32.partialorder %v690_v8, 8.507059e+37  ;;  %v693_v24 = vor.u32 1.1754944e-38, %v692_v11  ;;  %vm716_vm11 = vweird.f32 %v675_v6 }
 0x45d   :  { %1605 = vrcp.f32 %v2131_v7  ;;  %v720_v27 = vand.u32 2147483647, %v675_v6  ;;  %v722_v44 = vand.u32 2147483648, %v675_v6  ;;  %v735_v35 = vand.u32 2147483647, %v2131_v7 }
 0x45e   :  { %v737_v21 = vand.u32 2147483648, %v2131_v7  ;;  %vm706_vm5 = vcmp.eq.f32.partialorder %v705_v46, 8.507059e+37  ;;  %v708_v43 = vor.u32 1.1754944e-38, %v707_v52  ;;  %v2191_v46 = vld [vmem:[%s2540_s0 + $0x1d] sm:$0x1] }
 0x45f   :  { %v1598_v9 = vpop.eup %1597  ;;  %v723_v1 = vor.u32 1.1754944e-38, %v722_v44  ;;  %v958_v22 = vrot.slane %v2191_v46, 5 }
 0x460   :  { %v1600_v13 = vpop.eup %1599  ;;  %v682_v28 = vmul.f32 %v1598_v9, %v672_v4  ;;  %vm687_vm12 = vweird.f32 %v1598_v9  ;;  %v738_v39 = vor.u32 1.1754944e-38, %v737_v21 }
 0x461   :  { %v1602_v10 = vpop.eup %1601  ;;  %v743_v60 = vmul.f32 0.6931472, %v1600_v13  ;;  %vm2145_vm10 = vmor %vm686_vm15, %vm687_vm12  ;;  %vm721_vm12 = vcmp.eq.f32.partialorder %v720_v27, 8.507059e+37 }
 0x462   :  { %v1604_v15 = vpop.eup %1603  ;;  %v683_v16 = vsub.f32 1.0, %v682_v28  ;;  %v697_v50 = vmul.f32 %v1602_v10, %v674_v5  ;;  %vm702_vm0 = vweird.f32 %v1602_v10 }
 0x463   :  { %v1606_v23 = vpop.eup %1605  ;;  %v712_v17 = vmul.f32 %v1604_v15, %v675_v6  ;;  %v744_v19 = vadd.f32 %v743_v60, %v741_v14  ;;  %vm717_vm9 = vweird.f32 %v1604_v15  ;;  %vm703_vm13 = vmor %vm701_vm8, %vm702_vm0  ;;  %vm736_vm8 = vcmp.eq.f32.partialorder %v735_v35, 8.507059e+37 }
 0x464   :  { %v684_v29 = vmul.f32 %v1598_v9, %v683_v16  ;;  %v698_v30 = vsub.f32 1.0, %v697_v50  ;;  %v727_v26 = vmul.f32 %v1606_v23, %v2131_v7  ;;  %vm732_vm14 = vweird.f32 %v1606_v23  ;;  %vm718_vm15 = vmor %vm716_vm11, %vm717_vm9 }
 0x465   :  { %v713_v51 = vsub.f32 1.0, %v712_v17  ;;  %v2142_v3 = vsel %vm589_vm1, %v744_v19, %v2078_v38  ;;  %vm731_vm1 = vweird.f32 %v2131_v7  ;;  %vm2576_vm11 = vcmask 44032  }
 0x466   :  { %v685_v20 = vadd.f32 %v1598_v9, %v684_v29  ;;  %v699_v31 = vmul.f32 %v1602_v10, %v698_v30  ;;  %v728_v32 = vsub.f32 1.0, %v727_v26  ;;  %vm2577_vm0 = vmmov %vm2576_vm11 }
 0x467   :  { %v714_v58 = vmul.f32 %v1604_v15, %v713_v51 }
 0x468   :  { %v689_v37 = vsel %vm2145_vm10, %v1598_v9, %v685_v20  ;;  %v700_v38 = vadd.f32 %v1602_v10, %v699_v31  ;;  %v729_v40 = vmul.f32 %v1606_v23, %v728_v32  ;;  %vm733_vm10 = vmor %vm731_vm1, %vm732_vm14 }
 0x469   :  { %v715_v36 = vadd.f32 %v1604_v15, %v714_v58  ;;  %v694_v56 = vsel %vm2135_vm6, %v693_v24, %v689_v37 }
 0x46a   :  { %v704_v48 = vsel %vm703_vm13, %v1602_v10, %v700_v38  ;;  %v730_v55 = vadd.f32 %v1606_v23, %v729_v40  ;;  %v695_v5 = vmul.f32 %v694_v56, %v2116_v54  ;;  %v2180_v54 = vld [vmem:[%s2540_s0 + $0xd] sm:$0x1] }
 0x46b   :  { %v709_v57 = vsel %vm706_vm5, %v708_v43, %v704_v48  ;;  %v719_v59 = vsel %vm718_vm15, %v1604_v15, %v715_v36  ;;  %v954_v60 = vrot.slane %v2180_v54, 7 }
 0x46c   :  { %v710_v63 = vmul.f32 %v709_v57, %v2110_v53  ;;  %v724_v0 = vsel %vm721_vm12, %v723_v1, %v719_v59  ;;  %v734_v49 = vsel %vm733_vm10, %v1606_v23, %v730_v55  ;;  %v1516_v57 = vld [vmem:[%s2542_s1 + $0x10] sm:$0xf] }
 0x46d   :  { %v725_v2 = vmul.f32 %v724_v0, %v2112_v61  ;;  %v739_v4 = vsel %vm736_vm8, %v738_v39, %v734_v49  ;;  %v2170_v61 = vpop.xlane.xlu0 %782  ;;  %vm769_vm9 = vcmp.ne.f32.partialorder %v1516_v57, 0.0 }
 0x46e   :  { %v740_v6 = vmul.f32 %v739_v4, %v2114_v18  ;;  %v754_v7 = vrot.slane %v710_v63, 7  ;;  %v2175_v18 = vld [vmem:[%s2540_s0 + $0x5] sm:$0x1]  ;;  %v808_v10 = vrot.slane %v2170_v61, 1  ;;  %v809_v16 = vrot.slane %v2170_v61, 2 }
 0x46f   :  { %v756_v8 = vrot.slane %v725_v2, 6  ;;  %v810_v50 = vrot.slane %v2170_v61, 3  ;;  %v955_v52 = vsel %vm46_vm2, %v954_v60, %v2175_v18  ;;  %v815_v26 = vsub.f32 %v2027_v45, %v2170_v61 }
 0x470   :  { %v755_v9 = vsel %vm46_vm2, %v754_v7, %v695_v5  ;;  %v758_v11 = vrot.slane %v740_v6, 5  ;;  %v748_v13 = vpop.permute.xlu1 %747  ;;  %v816_v24 = vsub.f32 %v2016_v41, %v808_v10  ;;  %v817_v19 = vsub.f32 %v2021_v42, %v809_v16 }
 0x471   :  { %v757_v14 = vsel %vm49_vm3, %v756_v8, %v755_v9  ;;  %vm749_vm6 = vcmp.eq.s32.totalorder %v748_v13, 1  ;;  %v818_v30 = vsub.f32 %v2032_v47, %v810_v50  ;;  %v819_v20 = vmul.f32 1.442695, %v815_v26 }
 0x472   :  { %v759_v53 = vsel %vm52_vm4, %v758_v11, %v757_v14  ;;  %v821_v51 = vmul.f32 1.442695, %v816_v24  ;;  %v823_v27 = vmul.f32 1.442695, %v817_v19  ;;  %v925_v59 = vsel %vm769_vm9, 1, %v1681_v12 }
 0x473   :  { %v2166_v28 = vsel %vm749_vm6, %v759_v53, %v2102_v25  ;;  %v2185_v25 = vld [vmem:[%s2540_s0 + $0x15] sm:$0x1]  ;;  %v825_v44 = vmul.f32 1.442695, %v818_v30  ;;  %v921_v8 = vadd.f32 %v2170_v61, %v2142_v3 }
 0x474   :  { %1518 = vmatmul.msk.f32.vlgmr.msrb.gmra.mxu0 %vm59_vm7, %v2166_v28  ;;  %v956_v15 = vrot.slane %v2185_v25, 6  ;;  %1607 = vpow2.f32 %v821_v51 }
 0x475   :  { %1609 = vpow2.f32 %v823_v27 }
 0x476   :  { %v957_v23 = vsel %vm49_vm3, %v956_v15, %v955_v52  ;;  %1611 = vpow2.f32 %v825_v44 }
 0x477   :  { %v959_v17 = vsel %vm52_vm4, %v958_v22, %v957_v23  ;;  %1613 = vpow2.f32 %v819_v20 }
 0x478   :  { %v961_v29 = vsel %vm2576_vm11, %v959_v17, -inf }
 0x479   :  { %962 = vmax.xlane.f32.xlu1 %v961_v29 }
 0x47a   :  { %v1608_v41 = vpop.eup %1607 }
 0x47b   :  { %v1610_v31 = vpop.eup %1609 }
 0x47c   :  { %v1612_v32 = vpop.eup %1611 }
 0x47d   :  { %v1614_v47 = vpop.eup %1613 }
 0x4f1   :  { %v804_v42 = vpop.f32.mrf.mxu0 }
 0x4f2   :  { %v828_v33 = vrot.slane %v804_v42, 1  ;;  %v829_v58 = vrot.slane %v804_v42, 2  ;;  %v830_v35 = vrot.slane %v804_v42, 3  ;;  %v2214_v38 = vmul.f32 %v1614_v47, %v804_v42 }
 0x4f4   :  { %v2208_v21 = vmul.f32 %v1608_v41, %v828_v33  ;;  %v2210_v37 = vmul.f32 %v1610_v31, %v829_v58  ;;  %v2212_v45 = vmul.f32 %v1612_v32, %v830_v35 }
 0x4f6   :  { %v843_v40 = vrot.slane %v2208_v21, 7  ;;  %v845_v43 = vrot.slane %v2210_v37, 6  ;;  %v847_v48 = vrot.slane %v2212_v45, 5 }
 0x4f8   :  { %v844_v36 = vsel %vm46_vm2, %v843_v40, %v2214_v38 }
 0x4f9   :  { %v846_v1 = vsel %vm49_vm3, %v845_v43, %v844_v36 }
 0x4fa   :  { %v848_v55 = vsel %vm52_vm4, %v847_v48, %v846_v1 }
 0x4fb   :  { %v850_v56 = vsel %vm2577_vm0, %v848_v55, -inf }
 0x4fc   :  { %851 = vmax.xlane.f32.xlu2 %v850_v56 }
 0x514   :  { %927 = vperm.xlu2 %1531, %v925_v59  }
 0x56f   :  { %v852_v39 = vpop.xlane.xlu2 %851 }
 0x570   :  { %v854_v63 = vrot.slane %v852_v39, 1  ;;  %v855_v0 = vrot.slane %v852_v39, 2  ;;  %v2229_v49 = vrot.slane %v852_v39, 3  ;;  %1615 = vrcp.f32 %v852_v39 }
 0x571   :  { %1617 = vlog2.f32 %v852_v39  ;;  %v870_v2 = vand.u32 2147483647, %v852_v39  ;;  %v872_v5 = vand.u32 2147483648, %v852_v39  ;;  %vm866_vm14 = vweird.f32 %v852_v39 }
 0x572   :  { %1619 = vrcp.f32 %v854_v63  ;;  %vm881_vm13 = vweird.f32 %v854_v63  ;;  %v885_v11 = vand.u32 2147483647, %v854_v63  ;;  %v887_v15 = vand.u32 2147483648, %v854_v63 }
 0x573   :  { %1621 = vrcp.f32 %v855_v0  ;;  %vm2234_vm5 = vcmp.eq.f32.partialorder %v870_v2, 8.507059e+37  ;;  %v873_v22 = vor.u32 1.1754944e-38, %v872_v5  ;;  %vm896_vm1 = vweird.f32 %v855_v0 }
 0x574   :  { %1623 = vrcp.f32 %v2229_v49  ;;  %v900_v19 = vand.u32 2147483647, %v855_v0  ;;  %v902_v29 = vand.u32 2147483648, %v855_v0  ;;  %v915_v41 = vand.u32 2147483647, %v2229_v49 }
 0x575   :  { %v917_v31 = vand.u32 2147483648, %v2229_v49  ;;  %vm886_vm0 = vcmp.eq.f32.partialorder %v885_v11, 8.507059e+37  ;;  %v888_v33 = vor.u32 1.1754944e-38, %v887_v15  ;;  %v2290_v11 = vld [vmem:[%s2540_s0 + $0x1e] sm:$0x1] }
 0x576   :  { %v1616_v4 = vpop.eup %1615  ;;  %v903_v47 = vor.u32 1.1754944e-38, %v902_v29  ;;  %v1138_v10 = vrot.slane %v2290_v11, 5 }
 0x577   :  { %v1618_v6 = vpop.eup %1617  ;;  %v862_v7 = vmul.f32 %v1616_v4, %v852_v39  ;;  %vm867_vm15 = vweird.f32 %v1616_v4  ;;  %v918_v1 = vor.u32 1.1754944e-38, %v917_v31 }
 0x578   :  { %v1620_v9 = vpop.eup %1619  ;;  %v923_v13 = vmul.f32 0.6931472, %v1618_v6  ;;  %vm2244_vm10 = vmor %vm866_vm14, %vm867_vm15  ;;  %vm901_vm15 = vcmp.eq.f32.partialorder %v900_v19, 8.507059e+37 }
 0x579   :  { %v1622_v14 = vpop.eup %1621  ;;  %v863_v53 = vsub.f32 1.0, %v862_v7  ;;  %v877_v60 = vmul.f32 %v1620_v9, %v854_v63  ;;  %vm882_vm12 = vweird.f32 %v1620_v9 }
 0x57a   :  { %v1624_v16 = vpop.eup %1623  ;;  %v892_v50 = vmul.f32 %v1622_v14, %v855_v0  ;;  %v924_v52 = vadd.f32 %v923_v13, %v921_v8  ;;  %vm897_vm8 = vweird.f32 %v1622_v14  ;;  %vm883_vm11 = vmor %vm881_vm13, %vm882_vm12  ;;  %vm916_vm13 = vcmp.eq.f32.partialorder %v915_v41, 8.507059e+37 }
 0x57b   :  { %v864_v23 = vmul.f32 %v1616_v4, %v863_v53  ;;  %v878_v61 = vsub.f32 1.0, %v877_v60  ;;  %v907_v24 = vmul.f32 %v1624_v16, %v2229_v49  ;;  %vm912_vm6 = vweird.f32 %v1624_v16  ;;  %vm898_vm14 = vmor %vm896_vm1, %vm897_vm8 }
 0x57c   :  { %v893_v17 = vsub.f32 1.0, %v892_v50  ;;  %v2241_v30 = vsel %vm769_vm9, %v924_v52, %v2142_v3  ;;  %vm911_vm9 = vweird.f32 %v2229_v49  ;;  %vm2582_vm1 = vcmask 44032  }
 0x57d   :  { %v865_v26 = vadd.f32 %v1616_v4, %v864_v23  ;;  %v879_v51 = vmul.f32 %v1620_v9, %v878_v61  ;;  %v908_v27 = vsub.f32 1.0, %v907_v24  ;;  %vm2583_vm12 = vmmov %vm2582_vm1 }
 0x57e   :  { %v894_v20 = vmul.f32 %v1622_v14, %v893_v17 }
 0x57f   :  { %v869_v32 = vsel %vm2244_vm10, %v1616_v4, %v865_v26  ;;  %v880_v3 = vadd.f32 %v1620_v9, %v879_v51  ;;  %v909_v42 = vmul.f32 %v1624_v16, %v908_v27  ;;  %vm913_vm10 = vmor %vm911_vm9, %vm912_vm6  ;;  %v928_v4 = vpop.permute.xlu2 %927 }
 0x580   :  { %v895_v58 = vadd.f32 %v1622_v14, %v894_v20  ;;  %v874_v43 = vsel %vm2234_vm5, %v873_v22, %v869_v32  ;;  %vm929_vm5 = vcmp.eq.s32.totalorder %v928_v4, 1 }
 0x581   :  { %v884_v35 = vsel %vm883_vm11, %v1620_v9, %v880_v3  ;;  %v910_v40 = vadd.f32 %v1624_v16, %v909_v42  ;;  %v875_v63 = vmul.f32 %v874_v43, %v2214_v38  ;;  %v2279_v38 = vld [vmem:[%s2540_s0 + $0xe] sm:$0x1] }
 0x582   :  { %v889_v36 = vsel %vm886_vm0, %v888_v33, %v884_v35  ;;  %v899_v48 = vsel %vm898_vm14, %v1622_v14, %v895_v58  ;;  %v1134_v13 = vrot.slane %v2279_v38, 7 }
 0x583   :  { %v890_v55 = vmul.f32 %v889_v36, %v2208_v21  ;;  %v904_v56 = vsel %vm901_vm15, %v903_v47, %v899_v48  ;;  %v914_v57 = vsel %vm913_vm10, %v1624_v16, %v910_v40  ;;  %v2326_v36 = vld [vmem:[%s2542_s1 + $0x1c] sm:$0xf]  ;;  %vm2586_vm15 = vcmp.ne.f32.partialorder %v2044_v34, 0.0 }
 0x584   :  { %v905_v59 = vmul.f32 %v904_v56, %v2210_v37  ;;  %v919_v39 = vsel %vm916_vm13, %v918_v1, %v914_v57  ;;  %v2269_v37 = vpop.xlane.xlu1 %962  ;;  %vm2551_vm8 = vcmp.ne.f32.partialorder %v2326_v36, 0.0 }
 0x585   :  { %v920_v0 = vmul.f32 %v919_v39, %v2212_v45  ;;  %v934_v49 = vrot.slane %v890_v55, 7  ;;  %v2274_v45 = vld [vmem:[%s2540_s0 + $0x6] sm:$0x1]  ;;  %v988_v9 = vrot.slane %v2269_v37, 1  ;;  %v989_v53 = vrot.slane %v2269_v37, 2 }
 0x586   :  { %v936_v2 = vrot.slane %v905_v59, 6  ;;  %v990_v60 = vrot.slane %v2269_v37, 3  ;;  %v1135_v15 = vsel %vm46_vm2, %v1134_v13, %v2274_v45  ;;  %v995_v24 = vsub.f32 %v2175_v18, %v2269_v37 }
 0x587   :  { %v935_v5 = vsel %vm46_vm2, %v934_v49, %v875_v63  ;;  %v938_v6 = vrot.slane %v920_v0, 5  ;;  %v996_v22 = vsub.f32 %v2180_v54, %v988_v9  ;;  %v997_v52 = vsub.f32 %v2185_v25, %v989_v53 }
 0x588   :  { %v937_v7 = vsel %vm49_vm3, %v936_v2, %v935_v5  ;;  %v998_v61 = vsub.f32 %v2191_v46, %v990_v60  ;;  %v999_v26 = vmul.f32 1.442695, %v995_v24  ;;  %v1465_v48 = vsel %vm2551_vm8, 1, %v1681_v12 }
 0x589   :  { %v939_v21 = vsel %vm52_vm4, %v938_v6, %v937_v7  ;;  %v1001_v17 = vmul.f32 1.442695, %v996_v22  ;;  %v1003_v19 = vmul.f32 1.442695, %v997_v52  ;;  %v1101_v49 = vadd.f32 %v2269_v37, %v2241_v30 }
 0x58a   :  { %v2265_v8 = vsel %vm929_vm5, %v939_v21, %v2166_v28  ;;  %v2284_v28 = vld [vmem:[%s2540_s0 + $0x16] sm:$0x1]  ;;  %v1005_v29 = vmul.f32 1.442695, %v998_v61 }
 0x58b   :  { %1521 = vmatmul.msk.f32.vlgmr.msrb.gmra.mxu1 %vm59_vm7, %v2265_v8  ;;  %v1136_v14 = vrot.slane %v2284_v28, 6  ;;  %1625 = vpow2.f32 %v1001_v17 }
 0x58c   :  { %1627 = vpow2.f32 %v1003_v19  ;;  %v2412_v19 = vld [vmem:[%s2540_s0 + $0x1f] sm:$0x1] }
 0x58d   :  { %v1137_v16 = vsel %vm49_vm3, %v1136_v14, %v1135_v15  ;;  %1629 = vpow2.f32 %v1005_v29 }
 0x58e   :  { %v1139_v50 = vsel %vm52_vm4, %v1138_v10, %v1137_v16  ;;  %1631 = vpow2.f32 %v999_v26 }
 0x58f   :  { %v1141_v23 = vsel %vm2582_vm1, %v1139_v50, -inf }
 0x590   :  { %1142 = vmax.xlane.f32.xlu1 %v1141_v23 }
 0x591   :  { %v1626_v54 = vpop.eup %1625 }
 0x592   :  { %v1628_v51 = vpop.eup %1627 }
 0x593   :  { %v1630_v27 = vpop.eup %1629 }
 0x594   :  { %v1632_v46 = vpop.eup %1631 }
 0x608   :  { %v984_v25 = vpop.f32.mrf.mxu1 }
 0x609   :  { %v1008_v44 = vrot.slane %v984_v25, 1  ;;  %v1009_v20 = vrot.slane %v984_v25, 2  ;;  %v1010_v41 = vrot.slane %v984_v25, 3  ;;  %v2313_v3 = vmul.f32 %v1632_v46, %v984_v25 }
 0x60b   :  { %v2307_v31 = vmul.f32 %v1626_v54, %v1008_v44  ;;  %v2309_v32 = vmul.f32 %v1628_v51, %v1009_v20  ;;  %v2311_v18 = vmul.f32 %v1630_v27, %v1010_v41 }
 0x60d   :  { %v1023_v42 = vrot.slane %v2307_v31, 7  ;;  %v1025_v33 = vrot.slane %v2309_v32, 6  ;;  %v1027_v35 = vrot.slane %v2311_v18, 5 }
 0x60f   :  { %v1024_v58 = vsel %vm46_vm2, %v1023_v42, %v2313_v3 }
 0x610   :  { %v1026_v47 = vsel %vm49_vm3, %v1025_v33, %v1024_v58 }
 0x611   :  { %v1028_v40 = vsel %vm52_vm4, %v1027_v35, %v1026_v47 }
 0x612   :  { %v1030_v43 = vsel %vm2583_vm12, %v1028_v40, -inf }
 0x613   :  { %1031 = vmax.xlane.f32.xlu2 %v1030_v43 }
 0x62b   :  { %1467 = vperm.xlu2 %1531, %v1465_v48  }
 0x686   :  { %v1032_v1 = vpop.xlane.xlu2 %1031 }
 0x687   :  { %v1034_v55 = vrot.slane %v1032_v1, 1  ;;  %v1035_v56 = vrot.slane %v1032_v1, 2  ;;  %v2332_v57 = vrot.slane %v1032_v1, 3  ;;  %1633 = vrcp.f32 %v1032_v1 }
 0x688   :  { %1635 = vlog2.f32 %v1032_v1  ;;  %v1050_v59 = vand.u32 2147483647, %v1032_v1  ;;  %v1052_v63 = vand.u32 2147483648, %v1032_v1  ;;  %vm1046_vm6 = vweird.f32 %v1032_v1 }
 0x689   :  { %1637 = vrcp.f32 %v1034_v55  ;;  %vm1061_vm11 = vweird.f32 %v1034_v55  ;;  %v1065_v5 = vand.u32 2147483647, %v1034_v55  ;;  %v1067_v13 = vand.u32 2147483648, %v1034_v55 }
 0x68a   :  { %1639 = vrcp.f32 %v1035_v56  ;;  %vm2337_vm0 = vcmp.eq.f32.partialorder %v1050_v59, 8.507059e+37  ;;  %v1053_v10 = vor.u32 1.1754944e-38, %v1052_v63  ;;  %vm1076_vm9 = vweird.f32 %v1035_v56 }
 0x68b   :  { %1641 = vrcp.f32 %v2332_v57  ;;  %v1080_v52 = vand.u32 2147483647, %v1035_v56  ;;  %v1082_v23 = vand.u32 2147483648, %v1035_v56  ;;  %v1095_v26 = vand.u32 2147483647, %v2332_v57 }
 0x68c   :  { %v1097_v34 = vand.u32 2147483648, %v2332_v57  ;;  %v1068_v27 = vor.u32 1.1754944e-38, %v1067_v13 }
 0x68d   :  { %v1634_v39 = vpop.eup %1633  ;;  %vm1081_vm8 = vcmp.eq.f32.partialorder %v1080_v52, 8.507059e+37  ;;  %v1083_v20 = vor.u32 1.1754944e-38, %v1082_v23  ;;  %v2403_v23 = vld [vmem:[%s2540_s0 + $0x7] sm:$0x1] }
 0x68e   :  { %v1636_v0 = vpop.eup %1635  ;;  %v1042_v12 = vmul.f32 %v1634_v39, %v1032_v1  ;;  %vm1047_vm14 = vweird.f32 %v1634_v39  ;;  %v1098_v58 = vor.u32 1.1754944e-38, %v1097_v34 }
 0x68f   :  { %v1638_v2 = vpop.eup %1637  ;;  %v1103_v4 = vmul.f32 0.6931472, %v1636_v0  ;;  %vm2348_vm13 = vmor %vm1046_vm6, %vm1047_vm14  ;;  %vm1091_vm6 = vweird.f32 %v2332_v57 }
 0x690   :  { %v1640_v6 = vpop.eup %1639  ;;  %v1043_v7 = vsub.f32 1.0, %v1042_v12  ;;  %v1057_v9 = vmul.f32 %v1638_v2, %v1034_v55  ;;  %vm1062_vm10 = vweird.f32 %v1638_v2 }
 0x691   :  { %v1642_v14 = vpop.eup %1641  ;;  %v1104_v53 = vadd.f32 %v1103_v4, %v1101_v49  ;;  %v1072_v60 = vmul.f32 %v1640_v6, %v1035_v56  ;;  %vm1077_vm5 = vweird.f32 %v1640_v6  ;;  %vm1063_vm12 = vmor %vm1061_vm11, %vm1062_vm10  ;;  %vm1096_vm11 = vcmp.eq.f32.partialorder %v1095_v26, 8.507059e+37 }
 0x692   :  { %v1044_v37 = vmul.f32 %v1634_v39, %v1043_v7  ;;  %v1058_v15 = vsub.f32 1.0, %v1057_v9  ;;  %v1087_v16 = vmul.f32 %v1642_v14, %v2332_v57  ;;  %vm1092_vm1 = vweird.f32 %v1642_v14  ;;  %vm1078_vm14 = vmor %vm1076_vm9, %vm1077_vm5  ;;  %v1108_v57 = vpop.permute.xlu0 %1107 }
 0x693   :  { %v2345_v22 = vsel %vm2586_vm15, %v1104_v53, %v2241_v30  ;;  %v1073_v50 = vsub.f32 1.0, %v1072_v60  ;;  %vm1066_vm15 = vcmp.eq.f32.partialorder %v1065_v5, 8.507059e+37 }
 0x694   :  { %v1045_v61 = vadd.f32 %v1634_v39, %v1044_v37  ;;  %v1059_v24 = vmul.f32 %v1638_v2, %v1058_v15  ;;  %v1088_v17 = vsub.f32 1.0, %v1087_v16 }
 0x695   :  { %v1074_v29 = vmul.f32 %v1640_v6, %v1073_v50  ;;  %v2397_v50 = vld [vmem:[%s2540_s0 + $0x17] sm:$0x1] }
 0x696   :  { %v1049_v30 = vsel %vm2348_vm13, %v1634_v39, %v1045_v61  ;;  %v1060_v54 = vadd.f32 %v1638_v2, %v1059_v24  ;;  %v1089_v51 = vmul.f32 %v1642_v14, %v1088_v17  ;;  %vm1093_vm13 = vmor %vm1091_vm6, %vm1092_vm1 }
 0x697   :  { %v1075_v25 = vadd.f32 %v1640_v6, %v1074_v29  ;;  %v1054_v46 = vsel %vm2337_vm0, %v1053_v10, %v1049_v30  ;;  %vm1109_vm0 = vcmp.eq.s32.totalorder %v1108_v57, 1  ;;  %v1316_v29 = vrot.slane %v2397_v50, 6 }
 0x698   :  { %v1064_v44 = vsel %vm1063_vm12, %v1638_v2, %v1060_v54  ;;  %v1090_v41 = vadd.f32 %v1642_v14, %v1089_v51  ;;  %v1055_v1 = vmul.f32 %v1054_v46, %v2313_v3 }
 0x699   :  { %v1069_v42 = vsel %vm1066_vm15, %v1068_v27, %v1064_v44  ;;  %v1079_v33 = vsel %vm1078_vm14, %v1640_v6, %v1075_v25  ;;  %v1318_v27 = vrot.slane %v2412_v19, 5 }
 0x69a   :  { %v1070_v35 = vmul.f32 %v1069_v42, %v2307_v31  ;;  %v1084_v47 = vsel %vm1081_vm8, %v1083_v20, %v1079_v33  ;;  %v1094_v40 = vsel %vm1093_vm13, %v1642_v14, %v1090_v41  ;;  %vm2589_vm8 = vcmask 44032  }
 0x69b   :  { %v1085_v43 = vmul.f32 %v1084_v47, %v2309_v32  ;;  %v1099_v48 = vsel %vm1096_vm11, %v1098_v58, %v1094_v40  ;;  %v2373_v32 = vpop.xlane.xlu1 %1142  ;;  %vm2590_vm9 = vmmov %vm2589_vm8 }
 0x69c   :  { %v1100_v55 = vmul.f32 %v1099_v48, %v2311_v18  ;;  %v1114_v56 = vrot.slane %v1070_v35, 7  ;;  %v1168_v18 = vrot.slane %v2373_v32, 1  ;;  %v1169_v3 = vrot.slane %v2373_v32, 2 }
 0x69d   :  { %v1116_v59 = vrot.slane %v1085_v43, 6  ;;  %v1170_v12 = vrot.slane %v2373_v32, 3 }
 0x69e   :  { %v1115_v39 = vsel %vm46_vm2, %v1114_v56, %v1055_v1  ;;  %v1118_v63 = vrot.slane %v1100_v55, 5  ;;  %v1176_v2 = vsub.f32 %v2279_v38, %v1168_v18  ;;  %v1177_v4 = vsub.f32 %v2284_v28, %v1169_v3  ;;  %v2386_v38 = vld [vmem:[%s2540_s0 + $0xf] sm:$0x1] }
 0x69f   :  { %v1117_v0 = vsel %vm49_vm3, %v1116_v59, %v1115_v39  ;;  %v1178_v5 = vsub.f32 %v2290_v11, %v1170_v12  ;;  %v1314_v52 = vrot.slane %v2386_v38, 7  ;;  %v1281_v55 = vadd.f32 %v2373_v32, %v2345_v22 }
 0x6a0   :  { %v1119_v31 = vsel %vm52_vm4, %v1118_v63, %v1117_v0  ;;  %v1181_v6 = vmul.f32 1.442695, %v1176_v2  ;;  %v1183_v7 = vmul.f32 1.442695, %v1177_v4 }
 0x6a1   :  { %v2369_v49 = vsel %vm1109_vm0, %v1119_v31, %v2265_v8  ;;  %v1175_v8 = vsub.f32 %v2274_v45, %v2373_v32  ;;  %v1185_v21 = vmul.f32 1.442695, %v1178_v5  ;;  %v1315_v30 = vsel %vm46_vm2, %v1314_v52, %v2403_v23 }
 0x6a2   :  { %1524 = vmatmul.msk.f32.vlgmr.msrb.gmra.mxu2 %vm59_vm7, %v2369_v49  ;;  %1643 = vpow2.f32 %v1181_v6  ;;  %v1317_v44 = vsel %vm49_vm3, %v1316_v29, %v1315_v30 }
 0x6a3   :  { %v1179_v9 = vmul.f32 1.442695, %v1175_v8  ;;  %1645 = vpow2.f32 %v1183_v7  ;;  %v1319_v20 = vsel %vm52_vm4, %v1318_v27, %v1317_v44 }
 0x6a4   :  { %1647 = vpow2.f32 %v1185_v21  ;;  %v1321_v41 = vsel %vm2590_vm9, %v1319_v20, -inf }
 0x6a5   :  { %1649 = vpow2.f32 %v1179_v9 }
 0x6a8   :  { %v1644_v13 = vpop.eup %1643 }
 0x6a9   :  { %v1646_v14 = vpop.eup %1645 }
 0x6aa   :  { %v1648_v53 = vpop.eup %1647 }
 0x6ab   :  { %v1650_v60 = vpop.eup %1649 }
 0x725   :  { %v1164_v10 = vpop.f32.mrf.mxu2 }
 0x726   :  { %v1188_v28 = vrot.slane %v1164_v10, 1  ;;  %v1189_v11 = vrot.slane %v1164_v10, 2  ;;  %v1190_v45 = vrot.slane %v1164_v10, 3  ;;  %v2405_v61 = vmul.f32 %v1650_v60, %v1164_v10 }
 0x728   :  { %v2388_v37 = vmul.f32 %v1644_v13, %v1188_v28  ;;  %v2390_v15 = vmul.f32 %v1646_v14, %v1189_v11  ;;  %v2392_v16 = vmul.f32 %v1648_v53, %v1190_v45 }
 0x72a   :  { %v1203_v24 = vrot.slane %v2388_v37, 7  ;;  %v1205_v17 = vrot.slane %v2390_v15, 6  ;;  %v1207_v34 = vrot.slane %v2392_v16, 5 }
 0x72c   :  { %v1204_v26 = vsel %vm46_vm2, %v1203_v24, %v2405_v61 }
 0x72d   :  { %v1206_v54 = vsel %vm49_vm3, %v1205_v17, %v1204_v26 }
 0x72e   :  { %v1208_v51 = vsel %vm52_vm4, %v1207_v34, %v1206_v54 }
 0x72f   :  { %v1210_v25 = vsel %vm2589_vm8, %v1208_v51, -inf }
 0x730   :  { %1211 = vmax.xlane.f32.xlu1 %v1210_v25 }
 0x738   :  { %1322 = vmax.xlane.f32.xlu1 %v1321_v41 }
 0x7a3   :  { %v1212_v46 = vpop.xlane.xlu1 %1211 }
 0x7a4   :  { %v1214_v42 = vrot.slane %v1212_v46, 1  ;;  %v1215_v33 = vrot.slane %v1212_v46, 2  ;;  %v2427_v58 = vrot.slane %v1212_v46, 3  ;;  %1651 = vrcp.f32 %v1212_v46 }
 0x7a5   :  { %v1230_v47 = vand.u32 2147483647, %v1212_v46  ;;  %v1232_v48 = vand.u32 2147483648, %v1212_v46  ;;  %vm1226_vm10 = vweird.f32 %v1212_v46 }
 0x7a6   :  { %1653 = vrcp.f32 %v1214_v42  ;;  %vm1241_vm1 = vweird.f32 %v1214_v42  ;;  %v1245_v63 = vand.u32 2147483647, %v1214_v42  ;;  %v1247_v0 = vand.u32 2147483648, %v1214_v42 }
 0x7a7   :  { %1655 = vrcp.f32 %v1215_v33  ;;  %vm2432_vm5 = vcmp.eq.f32.partialorder %v1230_v47, 8.507059e+37  ;;  %v1233_v2 = vor.u32 1.1754944e-38, %v1232_v48  ;;  %vm1256_vm6 = vweird.f32 %v1215_v33  ;;  %v1288_v47 = vpop.permute.xlu0 %1287 }
 0x7a8   :  { %1657 = vrcp.f32 %v2427_v58  ;;  %v1262_v32 = vand.u32 2147483648, %v1215_v33  ;;  %vm2442_vm13 = vcmp.eq.f32.partialorder %v1245_v63, 8.507059e+37  ;;  %v1248_v9 = vor.u32 1.1754944e-38, %v1247_v0 }
 0x7a9   :  { %1659 = vlog2.f32 %v1212_v46  ;;  %v1260_v13 = vand.u32 2147483647, %v1215_v33  ;;  %v1275_v45 = vand.u32 2147483647, %v2427_v58  ;;  %v1277_v60 = vand.u32 2147483648, %v2427_v58 }
 0x7aa   :  { %v1652_v35 = vpop.eup %1651  ;;  %v1263_v29 = vor.u32 1.1754944e-38, %v1262_v32 }
 0x7ab   :  { %v1222_v40 = vmul.f32 %v1652_v35, %v1212_v46  ;;  %vm1227_vm12 = vweird.f32 %v1652_v35  ;;  %v1278_v46 = vor.u32 1.1754944e-38, %v1277_v60 }
 0x7ac   :  { %v1654_v43 = vpop.eup %1653  ;;  %vm2438_vm14 = vmor %vm1226_vm10, %vm1227_vm12  ;;  %vm2597_vm10 = vcmp.ne.f32.partialorder %v2053_v62, 0.0  ;;  %vm1271_vm12 = vweird.f32 %v2427_v58 }
 0x7ad   :  { %v1656_v1 = vpop.eup %1655  ;;  %v1223_v56 = vsub.f32 1.0, %v1222_v40  ;;  %v1237_v57 = vmul.f32 %v1654_v43, %v1214_v42  ;;  %vm1242_vm15 = vweird.f32 %v1654_v43 }
 0x7ae   :  { %v1658_v59 = vpop.eup %1657  ;;  %v1252_v12 = vmul.f32 %v1656_v1, %v1215_v33  ;;  %vm1257_vm11 = vweird.f32 %v1656_v1  ;;  %vm1243_vm0 = vmor %vm1241_vm1, %vm1242_vm15  ;;  %vm1261_vm1 = vcmp.eq.f32.partialorder %v1260_v13, 8.507059e+37  ;;  %vm1276_vm15 = vcmp.eq.f32.partialorder %v1275_v45, 8.507059e+37 }
 0x7af   :  { %v1660_v31 = vpop.eup %1659  ;;  %v1224_v18 = vmul.f32 %v1652_v35, %v1223_v56  ;;  %v1238_v3 = vsub.f32 1.0, %v1237_v57  ;;  %v1267_v6 = vmul.f32 %v1658_v59, %v2427_v58  ;;  %vm1272_vm8 = vweird.f32 %v1658_v59  ;;  %vm1258_vm9 = vmor %vm1256_vm6, %vm1257_vm11  ;;  %v1323_v58 = vpop.xlane.xlu1 %1322 }
 0x7b0   :  { %v1253_v8 = vsub.f32 1.0, %v1252_v12  ;;  %v1283_v14 = vmul.f32 0.6931472, %v1660_v31  ;;  %vm1289_vm6 = vcmp.eq.s32.totalorder %v1288_v47, 1  ;;  %v1348_v48 = vrot.slane %v1323_v58, 1 }
 0x7b1   :  { %v1225_v4 = vadd.f32 %v1652_v35, %v1224_v18  ;;  %v1239_v5 = vmul.f32 %v1654_v43, %v1238_v3  ;;  %v1268_v11 = vsub.f32 1.0, %v1267_v6 }
 0x7b2   :  { %v1254_v28 = vmul.f32 %v1656_v1, %v1253_v8  ;;  %v1284_v52 = vadd.f32 %v1283_v14, %v1281_v55  ;;  %v1350_v55 = vrot.slane %v1323_v58, 3  ;;  %v1356_v56 = vsub.f32 %v2386_v38, %v1348_v48 }
 0x7b3   :  { %v1229_v53 = vsel %vm2438_vm14, %v1652_v35, %v1225_v4  ;;  %v1240_v10 = vadd.f32 %v1654_v43, %v1239_v5  ;;  %v1269_v30 = vmul.f32 %v1658_v59, %v1268_v11 }
 0x7b4   :  { %v1255_v17 = vadd.f32 %v1656_v1, %v1254_v28  ;;  %v1234_v26 = vsel %vm2432_vm5, %v1233_v2, %v1229_v53  ;;  %v2460_v54 = vsel %vm2597_vm10, %v1284_v52, %v2345_v22  ;;  %vm1273_vm5 = vmor %vm1271_vm12, %vm1272_vm8  ;;  %v1358_v57 = vsub.f32 %v2412_v19, %v1350_v55 }
 0x7b5   :  { %v1244_v24 = vsel %vm1243_vm0, %v1654_v43, %v1240_v10  ;;  %v1270_v44 = vadd.f32 %v1658_v59, %v1269_v30  ;;  %v1235_v20 = vmul.f32 %v1234_v26, %v2405_v61  ;;  %v1361_v39 = vmul.f32 1.442695, %v1356_v56 }
 0x7b6   :  { %v1249_v34 = vsel %vm2442_vm13, %v1248_v9, %v1244_v24  ;;  %v1259_v27 = vsel %vm1258_vm9, %v1656_v1, %v1255_v17  ;;  %v1349_v1 = vrot.slane %v1323_v58, 2  ;;  %v1365_v0 = vmul.f32 1.442695, %v1358_v57 }
 0x7b7   :  { %v1250_v51 = vmul.f32 %v1249_v34, %v2388_v37  ;;  %v1264_v25 = vsel %vm1261_vm1, %v1263_v29, %v1259_v27  ;;  %v1274_v33 = vsel %vm1273_vm5, %v1658_v59, %v1270_v44  ;;  %v1355_v59 = vsub.f32 %v2403_v23, %v1323_v58 }
 0x7b8   :  { %v1265_v41 = vmul.f32 %v1264_v25, %v2390_v15  ;;  %v1279_v62 = vsel %vm1276_vm15, %v1278_v46, %v1274_v33  ;;  %1661 = vpow2.f32 %v1361_v39  ;;  %v1461_v29 = vadd.f32 %v1323_v58, %v2460_v54 }
 0x7b9   :  { %v1294_v42 = vrot.slane %v1250_v51, 7  ;;  %v1280_v37 = vmul.f32 %v1279_v62, %v2392_v16  ;;  %v1357_v16 = vsub.f32 %v2397_v50, %v1349_v1  ;;  %vm2601_vm9 = vcmp.ne.f32.partialorder %v2326_v36, 0.0 }
 0x7ba   :  { %v1296_v35 = vrot.slane %v1265_v41, 6  ;;  %vm2602_vm1 = vcmask 3072  }
 0x7bb   :  { %v1295_v22 = vsel %vm46_vm2, %v1294_v42, %v1235_v20  ;;  %v1298_v43 = vrot.slane %v1280_v37, 5  ;;  %v1363_v63 = vmul.f32 1.442695, %v1357_v16 }
 0x7bc   :  { %v1297_v40 = vsel %vm49_vm3, %v1296_v35, %v1295_v22 }
 0x7bd   :  { %v1299_v61 = vsel %vm52_vm4, %v1298_v43, %v1297_v40  ;;  %1663 = vpow2.f32 %v1363_v63 }
 0x7be   :  { %v2471_v15 = vsel %vm1289_vm6, %v1299_v61, %v2369_v49  ;;  %v1359_v49 = vmul.f32 1.442695, %v1355_v59  ;;  %1665 = vpow2.f32 %v1365_v0  ;;  %v1662_v31 = vpop.eup %1661 }
 0x7bf   :  { %1527 = vmatmul.msk.f32.vlgmr.msrb.gmra.mxu3 %vm59_vm7, %v2471_v15  ;;  %vm2598_vm7 = vcmask 44032  }
 0x7c0   :  { %1667 = vpow2.f32 %v1359_v49 }
 0x7c3   :  { %v1664_v18 = vpop.eup %1663 }
 0x7c4   :  { %v1666_v3 = vpop.eup %1665 }
 0x7c6   :  { %v1668_v50 = vpop.eup %1667 }
 0x842   :  { %v1344_v12 = vpop.f32.mrf.mxu3 }
 0x843   :  { %v1368_v2 = vrot.slane %v1344_v12, 1  ;;  %v1369_v38 = vrot.slane %v1344_v12, 2  ;;  %v1370_v32 = vrot.slane %v1344_v12, 3  ;;  %v2485_v5 = vmul.f32 %v1668_v50, %v1344_v12 }
 0x845   :  { %v2479_v4 = vmul.f32 %v1662_v31, %v1368_v2  ;;  %v2481_v19 = vmul.f32 %v1664_v18, %v1369_v38  ;;  %v2483_v23 = vmul.f32 %v1666_v3, %v1370_v32 }
 0x847   :  { %v1383_v8 = vrot.slane %v2479_v4, 7  ;;  %v1385_v6 = vrot.slane %v2481_v19, 6  ;;  %v1387_v21 = vrot.slane %v2483_v23, 5 }
 0x849   :  { %v1384_v7 = vsel %vm46_vm2, %v1383_v8, %v2485_v5 }
 0x84a   :  { %v1386_v9 = vsel %vm49_vm3, %v1385_v6, %v1384_v7 }
 0x84b   :  { %v1388_v13 = vsel %vm52_vm4, %v1387_v21, %v1386_v9  ;;  %v1468_v9 = vpop.permute.xlu2 %1467 }
 0x84c   :  { %v1390_v14 = vsel %vm2598_vm7, %v1388_v13, -inf }
 0x84d   :  { %1391 = vmax.xlane.f32.xlu0 %v1390_v14 }
 0x8c0   :  { %v1392_v53 = vpop.xlane.xlu0 %1391 }
 0x8c1   :  { %v1394_v10 = vrot.slane %v1392_v53, 1  ;;  %v1395_v28 = vrot.slane %v1392_v53, 2  ;;  %v2495_v11 = vrot.slane %v1392_v53, 3  ;;  %1669 = vrcp.f32 %v1392_v53 }
 0x8c2   :  { %1671 = vlog2.f32 %v1392_v53  ;;  %v1410_v45 = vand.u32 2147483647, %v1392_v53  ;;  %v1412_v52 = vand.u32 2147483648, %v1392_v53  ;;  %vm1406_vm14 = vweird.f32 %v1392_v53 }
 0x8c3   :  { %1673 = vrcp.f32 %v1394_v10  ;;  %vm1421_vm13 = vweird.f32 %v1394_v10  ;;  %v1425_v34 = vand.u32 2147483647, %v1394_v10  ;;  %v1427_v20 = vand.u32 2147483648, %v1394_v10 }
 0x8c4   :  { %1675 = vrcp.f32 %v1395_v28  ;;  %vm2499_vm11 = vcmp.eq.f32.partialorder %v1410_v45, 8.507059e+37  ;;  %v1413_v46 = vor.u32 1.1754944e-38, %v1412_v52  ;;  %vm1436_vm0 = vweird.f32 %v1395_v28 }
 0x8c5   :  { %1677 = vrcp.f32 %v2495_v11  ;;  %v1440_v47 = vand.u32 2147483647, %v1395_v28  ;;  %v1442_v40 = vand.u32 2147483648, %v1395_v28  ;;  %v1455_v56 = vand.u32 2147483647, %v2495_v11 }
 0x8c6   :  { %v1457_v16 = vand.u32 2147483648, %v2495_v11  ;;  %vm1426_vm7 = vcmp.eq.f32.partialorder %v1425_v34, 8.507059e+37  ;;  %v1428_v59 = vor.u32 1.1754944e-38, %v1427_v20 }
 0x8c7   :  { %v1670_v60 = vpop.eup %1669  ;;  %v1443_v0 = vor.u32 1.1754944e-38, %v1442_v40 }
 0x8c8   :  { %v1672_v24 = vpop.eup %1671  ;;  %v1402_v17 = vmul.f32 %v1670_v60, %v1392_v53  ;;  %vm1407_vm8 = vweird.f32 %v1670_v60  ;;  %v1458_v12 = vor.u32 1.1754944e-38, %v1457_v16 }
 0x8c9   :  { %v1674_v26 = vpop.eup %1673  ;;  %v1463_v30 = vmul.f32 0.6931472, %v1672_v24  ;;  %vm2509_vm12 = vmor %vm1406_vm14, %vm1407_vm8  ;;  %vm1451_vm14 = vweird.f32 %v2495_v11 }
 0x8ca   :  { %v1676_v51 = vpop.eup %1675  ;;  %v1403_v27 = vsub.f32 1.0, %v1402_v17  ;;  %v1417_v44 = vmul.f32 %v1674_v26, %v1394_v10  ;;  %vm1422_vm10 = vweird.f32 %v1674_v26 }
 0x8cb   :  { %v1678_v41 = vpop.eup %1677  ;;  %v1432_v42 = vmul.f32 %v1676_v51, %v1395_v28  ;;  %v1464_v33 = vadd.f32 %v1463_v30, %v1461_v29  ;;  %vm1437_vm5 = vweird.f32 %v1676_v51  ;;  %vm1423_vm6 = vmor %vm1421_vm13, %vm1422_vm10  ;;  %vm1456_vm13 = vcmp.eq.f32.partialorder %v1455_v56, 8.507059e+37 }
 0x8cc   :  { %v1404_v62 = vmul.f32 %v1670_v60, %v1403_v27  ;;  %v1418_v22 = vsub.f32 1.0, %v1417_v44  ;;  %v1447_v35 = vmul.f32 %v1678_v41, %v2495_v11  ;;  %vm1452_vm15 = vweird.f32 %v1678_v41  ;;  %vm1438_vm8 = vmor %vm1436_vm0, %vm1437_vm5 }
 0x8cd   :  { %v1433_v37 = vsub.f32 1.0, %v1432_v42  ;;  %v1482_v43 = vsel %vm2601_vm9, %v1464_v33, %v2460_v54  ;;  %vm1441_vm9 = vcmp.eq.f32.partialorder %v1440_v47, 8.507059e+37  ;;  %vm2605_vm0 = vcmask 44032  }
 0x8ce   :  { %v1405_v61 = vadd.f32 %v1670_v60, %v1404_v62  ;;  %v1419_v58 = vmul.f32 %v1674_v26, %v1418_v22  ;;  %v1448_v48 = vsub.f32 1.0, %v1447_v35  ;;  %1485 = vst.msk [vmem:[#allocation3] sm:$0xf] %vm2602_vm1, %v1482_v43  ;;  %vm1453_vm1 = vmor %vm1451_vm14, %vm1452_vm15 }
 0x8cf   :  { %v1434_v55 = vmul.f32 %v1676_v51, %v1433_v37  ;;  %vm2606_vm10 = vmmov %vm2605_vm0 }
 0x8d0   :  { %v1409_v36 = vsel %vm2509_vm12, %v1670_v60, %v1405_v61  ;;  %v1420_v54 = vadd.f32 %v1674_v26, %v1419_v58  ;;  %v1449_v57 = vmul.f32 %v1678_v41, %v1448_v48 }
 0x8d1   :  { %v1435_v39 = vadd.f32 %v1676_v51, %v1434_v55  ;;  %v1414_v31 = vsel %vm2499_vm11, %v1413_v46, %v1409_v36  ;;  %vm1469_vm11 = vcmp.eq.s32.totalorder %v1468_v9, 1 }
 0x8d2   :  { %v1424_v63 = vsel %vm1423_vm6, %v1674_v26, %v1420_v54  ;;  %v1450_v49 = vadd.f32 %v1678_v41, %v1449_v57  ;;  %v1415_v6 = vmul.f32 %v1414_v31, %v2485_v5 }
 0x8d3   :  { %v1429_v18 = vsel %vm1426_vm7, %v1428_v59, %v1424_v63  ;;  %v1439_v3 = vsel %vm1438_vm8, %v1676_v51, %v1435_v39 }
 0x8d4   :  { %v1430_v2 = vmul.f32 %v1429_v18, %v2479_v4  ;;  %v1444_v38 = vsel %vm1441_vm9, %v1443_v0, %v1439_v3  ;;  %v1454_v32 = vsel %vm1453_vm1, %v1678_v41, %v1450_v49  ;;  %v1534_v4 = vld [vmem:[%s2543_s4] ss:$0 sm:$0xff] }
 0x8d5   :  { %v1445_v50 = vmul.f32 %v1444_v38, %v2481_v19  ;;  %v1459_v8 = vsel %vm1456_vm13, %v1458_v12, %v1454_v32 }
 0x8d6   :  { %v1460_v7 = vmul.f32 %v1459_v8, %v2483_v23  ;;  %v1474_v21 = vrot.slane %v1430_v2, 7 }
 0x8d7   :  { %v1476_v13 = vrot.slane %v1445_v50, 6 }
 0x8d8   :  { %v1475_v14 = vsel %vm46_vm2, %v1474_v21, %v1415_v6  ;;  %v1478_v53 = vrot.slane %v1460_v7, 5  ;;  %vm2607_vm2 = vcmask 3072  }
 0x8d9   :  { %v1477_v10 = vsel %vm49_vm3, %v1476_v13, %v1475_v14 }
 0x8da   :  { %v1479_v19 = vsel %vm52_vm4, %v1478_v53, %v1477_v10 }
 0x8db   :  { %v1481_v28 = vsel %vm1469_vm11, %v1479_v19, %v2471_v15 }
 0x8dc   :  { %v1493_v5 = vmul.f32 %v1534_v4, %v1481_v28  ;;  %1483 = vst.msk [vmem:[#allocation2] sm:$0xf] %vm2605_vm0, %v1481_v28 }
 0x8de   :  { %v1494_v23 = vsel %vm2606_vm10, %v1493_v5, 0.0 }
 0x8df   :  { %1495 = vadd.xlane.f32.xlu1 %v1494_v23 }
 0x952   :  { %v1496_v11 = vpop.xlane.xlu1 %1495 }
 0x953   :  { %1679 = vlog2.f32 %v1496_v11 }
 0x959   :  { %v1680_v45 = vpop.eup %1679 }
 0x95a   :  { %v1498_v60 = vmul.f32 0.6931472, %v1680_v45 }
 0x95c   :  { %v1499_v52 = vadd.f32 %v1498_v60, %v1482_v43 }
 0x95e   :  { %1500 = vst.msk [vmem:[%s2544_s5] sm:$0xf] %vm2607_vm2, %v1499_v52 }

</bundles_post_ra>
